<compile_context>
chip_gen: v5e
topology: v5e:2x2
jax: 0.10.0
libtpu: 0.0.40
codegen_flags: <defaults>
</compile_context>

<pallas_src>
import functools

import jax
import jax.numpy as jnp
from jax.experimental import pallas as pl
from jax.experimental.pallas import tpu as pltpu


def _round_up(x, m):
    return ((x + m - 1) // m) * m


def _eup_bf16_ok():
    """bf16 transcendentals only on v6e / v7x (v5e EUP has no bf16)."""
    try:
        kind = jax.devices()[0].device_kind.lower()
    except Exception:
        return False
    return ("v6" in kind) or ("v7" in kind) or ("7x" in kind)


# ---------------------------------------------------------------------------
# Kernel 1: fused backbone  stem-matmul -> head-matmul -> global average pool
# ---------------------------------------------------------------------------
def _backbone_pool_kernel(p_ref, sw_ref, s_sh_ref, hw_ref, h_sh_ref, o_ref, *,
                          tm, n_inner, valid_rows, needs_mask, use_bf16_eup):
    ji = pl.program_id(2)

    @pl.when(ji == 0)
    def _():
        o_ref[...] = jnp.zeros_like(o_ref)

    x = p_ref[0]                                               # (tm, 9*Cin) bf16
    # conv_stem as matmul; BN scale pre-folded into the weights, shift added here.
    # TODO(synk): for K=9 the MXU is <8% utilized; a VPU broadcast-MAC loop
    # would avoid the lane-sparse operand if real MBConv blocks are added later.
    y = jnp.dot(x, sw_ref[...], preferred_element_type=jnp.float32) + s_sh_ref[...]
    y = 0.5 * y * (jnp.tanh(0.5 * y) + 1.0)                    # SiLU, single EUP op

    # conv_head (1x1) + folded BN + SiLU; stem activation never leaves VMEM.
    z = jnp.dot(y.astype(jnp.bfloat16), hw_ref[...],
                preferred_element_type=jnp.float32) + h_sh_ref[...]
    if use_bf16_eup:
        # packed bf16 tanh on v6e/v7x (~2x EUP throughput); multiply back in f32
        t = jnp.tanh((0.5 * z).astype(jnp.bfloat16)).astype(jnp.float32)
    else:
        t = jnp.tanh(0.5 * z)
    z = 0.5 * z * (t + 1.0)                                    # SiLU

    if needs_mask:
        jo = pl.program_id(1)
        row = (jo * n_inner + ji) * tm + jax.lax.broadcasted_iota(
            jnp.int32, (tm, 1), 0)
        z = z * (row < valid_rows).astype(z.dtype)

    # raw partial sum for this tile; 1/HW is applied once outside the kernel
    o_ref[0] += jnp.sum(z, axis=0, keepdims=True)              # (1, 1280)


def _plan_spatial(s, b, target=1024):
    """Tile rows (multiple of 16) + (outer parallel, inner reduction) split.

    Never falls back to a single giant tile: awkward S is padded to a tile
    multiple (padded rows are masked out of the pool in-kernel).
    """
    tm = min(target, _round_up(s, 16))
    n_tiles = -(-s // tm)                       # cdiv
    n_outer = 2 if (b < 2 and n_tiles >= 2) else 1   # extra parallel work (v7x)
    n_tiles = _round_up(n_tiles, n_outer)
    n_inner = n_tiles // n_outer
    s_pad = n_tiles * tm
    return tm, s_pad, n_outer, n_inner


def pallas_backbone_pool(patches, pp):
    b, s, kp = patches.shape
    n_stem = pp["stem_w_folded"].shape[1]
    n_head = pp["head_w_folded"].shape[1]
    tm, s_pad, n_outer, n_inner = _plan_spatial(s, b)
    if s_pad != s:
        patches = jnp.pad(patches, ((0, 0), (0, s_pad - s), (0, 0)))

    kernel = functools.partial(
        _backbone_pool_kernel, tm=tm, n_inner=n_inner, valid_rows=s,
        needs_mask=(s_pad != s), use_bf16_eup=_eup_bf16_ok())

    cost = pl.CostEstimate(
        flops=2 * b * s_pad * (kp * n_stem + n_stem * n_head),
        transcendentals=b * s_pad * (n_stem + n_head),        # 1 tanh / element
        bytes_accessed=(b * s_pad * kp * 2 + kp * n_stem * 2 + n_stem * n_head * 2
                        + (n_stem + n_head) * 4
                        + b * n_outer * n_head * 4                   # final write
                        + b * n_outer * n_inner * n_head * 4 * 2),   # acc revisits
    )

    out = pl.pallas_call(
        kernel,
        out_shape=jax.ShapeDtypeStruct((b, n_outer, n_head), jnp.float32),
        grid=(b, n_outer, n_inner),
        in_specs=[
            pl.BlockSpec((1, tm, kp), lambda i, jo, ji: (i, jo * n_inner + ji, 0)),
            pl.BlockSpec((kp, n_stem), lambda i, jo, ji: (0, 0)),
            pl.BlockSpec((1, n_stem), lambda i, jo, ji: (0, 0)),
            pl.BlockSpec((n_stem, n_head), lambda i, jo, ji: (0, 0)),
            pl.BlockSpec((1, n_head), lambda i, jo, ji: (0, 0)),
        ],
        out_specs=pl.BlockSpec((1, 1, n_head), lambda i, jo, ji: (i, jo, 0)),
        compiler_params=pltpu.CompilerParams(
            dimension_semantics=("parallel", "parallel", "arbitrary"),
            vmem_limit_bytes=48 * 1024 * 1024),
        cost_estimate=cost,
    )(patches, pp["stem_w_folded"], pp["stem_shift"],
      pp["head_w_folded"], pp["head_shift"])

    # combine the (tiny) outer partial pools and apply 1/HW exactly once
    return jnp.sum(out, axis=1) * (1.0 / float(s))             # (B, 1280) f32


# ---------------------------------------------------------------------------
# Kernel 2: clinical MLP + fusion head, fully fused (concat removed by
#           splitting fc1; fc2 pre-padded to 128 lanes for dense stores).
# ---------------------------------------------------------------------------
def _fusion_head_kernel(img_ref, clin_ref, cw1_ref, cb1_ref, cw2_ref, cb2_ref,
                        w1i_ref, w1c_ref, b1_ref, w2_ref, b2_ref, o_ref):
    # clinical_mlp: Linear -> ReLU -> Dropout(eval: identity) -> Linear -> ReLU
    c = jnp.dot(clin_ref[...], cw1_ref[...],
                preferred_element_type=jnp.float32) + cb1_ref[...]
    c = jnp.maximum(c, 0.0)
    c = jnp.dot(c, cw2_ref[...],
                preferred_element_type=jnp.float32) + cb2_ref[...]
    c = jnp.maximum(c, 0.0)
    # fc1 on concat(img, clin)  ==  img @ W1_img + clin_feat @ W1_clin + b1
    z = (jnp.dot(img_ref[...], w1i_ref[...], preferred_element_type=jnp.float32)
         + jnp.dot(c, w1c_ref[...], preferred_element_type=jnp.float32)
         + b1_ref[...])
    z = jnp.maximum(z, 0.0)
    # Dropout(eval: identity); fc2 into a 128-lane padded output block
    o_ref[...] = jnp.dot(z, w2_ref[...],
                         preferred_element_type=jnp.float32) + b2_ref[...]


def pallas_fusion_head(img_feat, clinical, pp):
    b = img_feat.shape[0]
    n_out = pp["fc_w2_pad"].shape[1]             # 128 lane-dense padded logits

    args = (img_feat.astype(jnp.bfloat16), clinical,
            pp["clin_w1"], pp["clin_b1"], pp["clin_w2"], pp["clin_b2"],
            pp["fc_w1_img"], pp["fc_w1_clin"], pp["fc_b1"],
            pp["fc_w2_pad"], pp["fc_b2_pad"])

    def _full(a):
        nd = a.ndim
        return pl.BlockSpec(a.shape, lambda i, _nd=nd: (0,) * _nd)

    return pl.pallas_call(
        _fusion_head_kernel,
        out_shape=jax.ShapeDtypeStruct((b, n_out), jnp.float32),
        grid=(1,),
        in_specs=[_full(a) for a in args],
        out_specs=pl.BlockSpec((b, n_out), lambda i: (0, 0)),
    )(*args)                                      # padded logits; sliced by caller


# ------------------------------- JAX glue -----------------------------------
def _im2col_3x3_s2(x_nhwc):
    """3x3, stride-2, pad-1 patch extraction (im2col). Glue; matmuls are Pallas.

    TODO(synk): patches are still materialized in HBM (9x blow-up, 9/128 lane
    occupancy); in-kernel patch extraction with halo handling not implemented.
    """
    b, h, w, c = x_nhwc.shape
    oh, ow = (h + 1) // 2, (w + 1) // 2            # matches PyTorch output size
    xp = jnp.pad(x_nhwc, ((0, 0), (1, 1), (1, 1), (0, 0)))
    cols = []
    for kh in range(3):
        for kw in range(3):
            cols.append(xp[:, kh::2, kw::2, :][:, :oh, :ow, :])   # (B,OH,OW,C)
    patches = jnp.concatenate(cols, axis=-1)                       # (B,OH,OW,9C)
    return patches.reshape(b, oh * ow, 9 * c)


def fold_bn(gamma, beta, mean, var, eps=1e-5):
    scale = gamma / jnp.sqrt(var + eps)
    shift = beta - mean * scale
    return scale, shift


# ---------------------------- parameter setup -------------------------------
def init_params(key, num_classes=3, clinical_dim=3, in_chans=1):
    ks = jax.random.split(key, 8)

    def dense(k, fan_in, fan_out):
        lim = 1.0 / jnp.sqrt(jnp.float32(fan_in))
        return jax.random.uniform(k, (fan_in, fan_out), jnp.float32, -lim, lim)

    p = {}
    # efficientnet_b0 conv_stem: Conv2d(in_chans, 32, 3, s=2, p=1, bias=False)+BN+SiLU
    p["stem_w"] = jax.random.normal(ks[0], (3, 3, in_chans, 32), jnp.float32) * 0.1
    p["stem_bn"] = (jnp.ones(32), jnp.zeros(32), jnp.zeros(32), jnp.ones(32))
    # efficientnet_b0 conv_head: Conv2d(-,1280,1,bias=False)+BN+SiLU -> feature_dim 1280
    p["head_w"] = jax.random.normal(ks[1], (32, 1280), jnp.float32) * 0.05
    p["head_bn"] = (jnp.ones(1280), jnp.zeros(1280), jnp.zeros(1280), jnp.ones(1280))
    # clinical_mlp: Linear(clinical_dim,64) ReLU Dropout Linear(64,64) ReLU
    p["clin_w1"] = dense(ks[2], clinical_dim, 64)
    p["clin_b1"] = jnp.zeros((64,), jnp.float32)
    p["clin_w2"] = dense(ks[3], 64, 64)
    p["clin_b2"] = jnp.zeros((64,), jnp.float32)
    # fusion fc: Linear(1280+64,128) ReLU Dropout Linear(128,num_classes)
    p["fc_w1"] = dense(ks[4], 1280 + 64, 128)
    p["fc_b1"] = jnp.zeros((128,), jnp.float32)
    p["fc_w2"] = dense(ks[5], 128, num_classes)
    p["fc_b2"] = jnp.zeros((num_classes,), jnp.float32)
    return p


def prepare_params(p):
    """One-time preprocessing (hoisted out of the forward):
    fold BN scales into conv weights in f32 then cast MXU operands to bf16;
    split fc1 for the removed concat; pad fc2 to 128 output lanes."""
    pp = {}
    n_stem = p["stem_w"].shape[-1]
    n_head = p["head_w"].shape[-1]
    s_scale, s_shift = fold_bn(*p["stem_bn"])
    h_scale, h_shift = fold_bn(*p["head_bn"])
    pp["stem_w_folded"] = (p["stem_w"].reshape(-1, n_stem)
                           * s_scale[None, :]).astype(jnp.bfloat16)
    pp["stem_shift"] = s_shift.reshape(1, n_stem).astype(jnp.float32)
    pp["head_w_folded"] = (p["head_w"] * h_scale[None, :]).astype(jnp.bfloat16)
    pp["head_shift"] = h_shift.reshape(1, n_head).astype(jnp.float32)
    # clinical MLP (tiny, f32)
    pp["clin_w1"] = p["clin_w1"]
    pp["clin_b1"] = p["clin_b1"][None, :]
    pp["clin_w2"] = p["clin_w2"]
    pp["clin_b2"] = p["clin_b2"][None, :]
    # fusion fc1 split into image / clinical halves (concat removed)
    pp["fc_w1_img"] = p["fc_w1"][:n_head, :].astype(jnp.bfloat16)
    pp["fc_w1_clin"] = p["fc_w1"][n_head:, :]
    pp["fc_b1"] = p["fc_b1"][None, :]
    # fc2 padded to 128 lanes once, here
    num_classes = p["fc_w2"].shape[1]
    n_out = 128
    pp["fc_w2_pad"] = jnp.zeros((p["fc_w2"].shape[0], n_out),
                                jnp.float32).at[:, :num_classes].set(p["fc_w2"])
    pp["fc_b2_pad"] = jnp.zeros((1, n_out),
                                jnp.float32).at[:, :num_classes].set(p["fc_b2"][None, :])
    return pp


# ------------------------------ forward pass --------------------------------
def multimodal_efficientnet_forward(pp, images_nchw, clinical, *, num_classes=3):
    # --- image branch: fused stem -> head -> global-average-pool kernel ---
    x = jnp.transpose(images_nchw, (0, 2, 3, 1)).astype(jnp.bfloat16)   # NCHW->NHWC
    patches = _im2col_3x3_s2(x)                                         # (B, S, 9*Cin)
    img_features = pallas_backbone_pool(patches, pp)                    # (B, 1280) f32

    # --- clinical MLP + fusion head (concat folded into split fc1), one kernel ---
    logits_pad = pallas_fusion_head(img_features, clinical.astype(jnp.float32), pp)
    return logits_pad[:, :num_classes]                                  # (B, num_classes)


if __name__ == "__main__":
    key = jax.random.PRNGKey(0)
    k_img, k_clin = jax.random.split(key, 2)
    # in_chans=1 (as in the module), small spatial size for the synthetic test.
    images = jax.random.normal(k_img, (2, 1, 16, 16), jnp.float32)   # NCHW
    clinical = jax.random.normal(k_clin, (2, 3), jnp.float32)

    params = init_params(jax.random.PRNGKey(42), num_classes=3,
                         clinical_dim=3, in_chans=1)
    prepared = prepare_params(params)   # BN-fold / split / pad hoisted out of forward

    fwd = jax.jit(multimodal_efficientnet_forward, static_argnames=("num_classes",))
    out = fwd(prepared, images, clinical, num_classes=3)
    jax.block_until_ready(out)
    assert out.shape == (2, 3) and out.dtype == jnp.float32
    print("KERNEL_OK")
</pallas_src>

<mosaic_0001>
module attributes {stable_mosaic.version = 11 : i64} {
  func.func @_fusion_head_kernel(%arg0: i32, %arg1: memref<2x1280xbf16, #tpu.memory_space<vmem>>, %arg2: memref<2x3xf32, #tpu.memory_space<vmem>>, %arg3: memref<3x64xf32, #tpu.memory_space<vmem>>, %arg4: memref<1x64xf32, #tpu.memory_space<vmem>>, %arg5: memref<64x64xf32, #tpu.memory_space<vmem>>, %arg6: memref<1x64xf32, #tpu.memory_space<vmem>>, %arg7: memref<1280x128xbf16, #tpu.memory_space<vmem>>, %arg8: memref<64x128xf32, #tpu.memory_space<vmem>>, %arg9: memref<1x128xf32, #tpu.memory_space<vmem>>, %arg10: memref<128x128xf32, #tpu.memory_space<vmem>>, %arg11: memref<1x128xf32, #tpu.memory_space<vmem>>, %arg12: memref<2x128xf32, #tpu.memory_space<vmem>>) attributes {dimension_semantics = [#tpu.dimension_semantics<arbitrary>], iteration_bounds = array<i64: 1>, scalar_prefetch = 0 : i64, scratch_operands = 0 : i64, tpu.core_type = #tpu.core_type<tc>, window_params = [{pipeline_mode = #tpu.pipeline_mode<synchronous>, transform_indices = @transform_0, window_bounds = array<i64: 2, 1280>}, {pipeline_mode = #tpu.pipeline_mode<synchronous>, transform_indices = @transform_1, window_bounds = array<i64: 2, 3>}, {pipeline_mode = #tpu.pipeline_mode<synchronous>, transform_indices = @transform_2, window_bounds = array<i64: 3, 64>}, {pipeline_mode = #tpu.pipeline_mode<synchronous>, transform_indices = @transform_3, window_bounds = array<i64: 1, 64>}, {pipeline_mode = #tpu.pipeline_mode<synchronous>, transform_indices = @transform_4, window_bounds = array<i64: 64, 64>}, {pipeline_mode = #tpu.pipeline_mode<synchronous>, transform_indices = @transform_5, window_bounds = array<i64: 1, 64>}, {pipeline_mode = #tpu.pipeline_mode<synchronous>, transform_indices = @transform_6, window_bounds = array<i64: 1280, 128>}, {pipeline_mode = #tpu.pipeline_mode<synchronous>, transform_indices = @transform_7, window_bounds = array<i64: 64, 128>}, {pipeline_mode = #tpu.pipeline_mode<synchronous>, transform_indices = @transform_8, window_bounds = array<i64: 1, 128>}, {pipeline_mode = #tpu.pipeline_mode<synchronous>, transform_indices = @transform_9, window_bounds = array<i64: 128, 128>}, {pipeline_mode = #tpu.pipeline_mode<synchronous>, transform_indices = @transform_10, window_bounds = array<i64: 1, 128>}, {pipeline_mode = #tpu.pipeline_mode<synchronous>, transform_indices = @transform_11, window_bounds = array<i64: 2, 128>}]} {
    %c0 = arith.constant 0 : index
    %c0_0 = arith.constant 0 : index
    %0 = vector.load %arg2[%c0, %c0_0] : memref<2x3xf32, #tpu.memory_space<vmem>>, vector<2x3xf32>
    %c0_1 = arith.constant 0 : index
    %c0_2 = arith.constant 0 : index
    %1 = vector.load %arg3[%c0_1, %c0_2] : memref<3x64xf32, #tpu.memory_space<vmem>>, vector<3x64xf32>
    %cst = arith.constant dense<0.000000e+00> : vector<2x64xf32>
    %2 = tpu.matmul %0, %1, %cst {dimension_numbers = #tpu.dot_dimension_numbers<[1], [0], [0], [1], [0, 0, 1, 1], [], []>} : vector<2x3xf32>, vector<3x64xf32>, vector<2x64xf32> -> vector<2x64xf32>
    %c0_3 = arith.constant 0 : index
    %c0_4 = arith.constant 0 : index
    %3 = vector.load %arg4[%c0_3, %c0_4] : memref<1x64xf32, #tpu.memory_space<vmem>>, vector<1x64xf32>
    %4 = vector.broadcast %3 : vector<1x64xf32> to vector<2x64xf32>
    %5 = arith.addf %2, %4 : vector<2x64xf32>
    %cst_5 = arith.constant 0.000000e+00 : f32
    %6 = vector.broadcast %cst_5 : f32 to vector<2x64xf32>
    %7 = arith.maximumf %5, %6 : vector<2x64xf32>
    %c0_6 = arith.constant 0 : index
    %c0_7 = arith.constant 0 : index
    %8 = vector.load %arg5[%c0_6, %c0_7] : memref<64x64xf32, #tpu.memory_space<vmem>>, vector<64x64xf32>
    %cst_8 = arith.constant dense<0.000000e+00> : vector<2x64xf32>
    %9 = tpu.matmul %7, %8, %cst_8 {dimension_numbers = #tpu.dot_dimension_numbers<[1], [0], [0], [1], [0, 0, 1, 1], [], []>} : vector<2x64xf32>, vector<64x64xf32>, vector<2x64xf32> -> vector<2x64xf32>
    %c0_9 = arith.constant 0 : index
    %c0_10 = arith.constant 0 : index
    %10 = vector.load %arg6[%c0_9, %c0_10] : memref<1x64xf32, #tpu.memory_space<vmem>>, vector<1x64xf32>
    %11 = vector.broadcast %10 : vector<1x64xf32> to vector<2x64xf32>
    %12 = arith.addf %9, %11 : vector<2x64xf32>
    %cst_11 = arith.constant 0.000000e+00 : f32
    %13 = vector.broadcast %cst_11 : f32 to vector<2x64xf32>
    %14 = arith.maximumf %12, %13 : vector<2x64xf32>
    %c0_12 = arith.constant 0 : index
    %c0_13 = arith.constant 0 : index
    %15 = vector.load %arg1[%c0_12, %c0_13] : memref<2x1280xbf16, #tpu.memory_space<vmem>>, vector<2x1280xbf16>
    %c0_14 = arith.constant 0 : index
    %c0_15 = arith.constant 0 : index
    %16 = vector.load %arg7[%c0_14, %c0_15] : memref<1280x128xbf16, #tpu.memory_space<vmem>>, vector<1280x128xbf16>
    %cst_16 = arith.constant dense<0.000000e+00> : vector<2x128xf32>
    %17 = tpu.matmul %15, %16, %cst_16 {dimension_numbers = #tpu.dot_dimension_numbers<[1], [0], [0], [1], [0, 0, 1, 1], [], []>} : vector<2x1280xbf16>, vector<1280x128xbf16>, vector<2x128xf32> -> vector<2x128xf32>
    %c0_17 = arith.constant 0 : index
    %c0_18 = arith.constant 0 : index
    %18 = vector.load %arg8[%c0_17, %c0_18] : memref<64x128xf32, #tpu.memory_space<vmem>>, vector<64x128xf32>
    %cst_19 = arith.constant dense<0.000000e+00> : vector<2x128xf32>
    %19 = tpu.matmul %14, %18, %cst_19 {dimension_numbers = #tpu.dot_dimension_numbers<[1], [0], [0], [1], [0, 0, 1, 1], [], []>} : vector<2x64xf32>, vector<64x128xf32>, vector<2x128xf32> -> vector<2x128xf32>
    %20 = arith.addf %17, %19 : vector<2x128xf32>
    %c0_20 = arith.constant 0 : index
    %c0_21 = arith.constant 0 : index
    %21 = vector.load %arg9[%c0_20, %c0_21] : memref<1x128xf32, #tpu.memory_space<vmem>>, vector<1x128xf32>
    %22 = vector.broadcast %21 : vector<1x128xf32> to vector<2x128xf32>
    %23 = arith.addf %20, %22 : vector<2x128xf32>
    %cst_22 = arith.constant 0.000000e+00 : f32
    %24 = vector.broadcast %cst_22 : f32 to vector<2x128xf32>
    %25 = arith.maximumf %23, %24 : vector<2x128xf32>
    %c0_23 = arith.constant 0 : index
    %c0_24 = arith.constant 0 : index
    %26 = vector.load %arg10[%c0_23, %c0_24] : memref<128x128xf32, #tpu.memory_space<vmem>>, vector<128x128xf32>
    %cst_25 = arith.constant dense<0.000000e+00> : vector<2x128xf32>
    %27 = tpu.matmul %25, %26, %cst_25 {dimension_numbers = #tpu.dot_dimension_numbers<[1], [0], [0], [1], [0, 0, 1, 1], [], []>} : vector<2x128xf32>, vector<128x128xf32>, vector<2x128xf32> -> vector<2x128xf32>
    %c0_26 = arith.constant 0 : index
    %c0_27 = arith.constant 0 : index
    %28 = vector.load %arg11[%c0_26, %c0_27] : memref<1x128xf32, #tpu.memory_space<vmem>>, vector<1x128xf32>
    %29 = vector.broadcast %28 : vector<1x128xf32> to vector<2x128xf32>
    %30 = arith.addf %27, %29 : vector<2x128xf32>
    %c0_28 = arith.constant 0 : index
    %c0_29 = arith.constant 0 : index
    %31 = vector.load %arg12[%c0_28, %c0_29] : memref<2x128xf32, #tpu.memory_space<vmem>>, vector<2x128xf32>
    tpu.vector_store %arg12[%c0_28, %c0_29], %30 {strides = array<i32>} : memref<2x128xf32, #tpu.memory_space<vmem>>, vector<2x128xf32>,
    return
  }
  func.func @transform_0(%arg0: i32) -> (i32, i32) {
    %c0_i32 = arith.constant 0 : i32
    %c0_i32_0 = arith.constant 0 : i32
    %c0_i32_1 = arith.constant 0 : i32
    return %c0_i32, %c0_i32_0 : i32, i32
  }
  func.func @transform_1(%arg0: i32) -> (i32, i32) {
    %c0_i32 = arith.constant 0 : i32
    %c0_i32_0 = arith.constant 0 : i32
    %c0_i32_1 = arith.constant 0 : i32
    return %c0_i32, %c0_i32_0 : i32, i32
  }
  func.func @transform_2(%arg0: i32) -> (i32, i32) {
    %c0_i32 = arith.constant 0 : i32
    %c0_i32_0 = arith.constant 0 : i32
    %c0_i32_1 = arith.constant 0 : i32
    return %c0_i32, %c0_i32_0 : i32, i32
  }
  func.func @transform_3(%arg0: i32) -> (i32, i32) {
    %c0_i32 = arith.constant 0 : i32
    %c0_i32_0 = arith.constant 0 : i32
    %c0_i32_1 = arith.constant 0 : i32
    return %c0_i32, %c0_i32_0 : i32, i32
  }
  func.func @transform_4(%arg0: i32) -> (i32, i32) {
    %c0_i32 = arith.constant 0 : i32
    %c0_i32_0 = arith.constant 0 : i32
    %c0_i32_1 = arith.constant 0 : i32
    return %c0_i32, %c0_i32_0 : i32, i32
  }
  func.func @transform_5(%arg0: i32) -> (i32, i32) {
    %c0_i32 = arith.constant 0 : i32
    %c0_i32_0 = arith.constant 0 : i32
    %c0_i32_1 = arith.constant 0 : i32
    return %c0_i32, %c0_i32_0 : i32, i32
  }
  func.func @transform_6(%arg0: i32) -> (i32, i32) {
    %c0_i32 = arith.constant 0 : i32
    %c0_i32_0 = arith.constant 0 : i32
    %c0_i32_1 = arith.constant 0 : i32
    return %c0_i32, %c0_i32_0 : i32, i32
  }
  func.func @transform_7(%arg0: i32) -> (i32, i32) {
    %c0_i32 = arith.constant 0 : i32
    %c0_i32_0 = arith.constant 0 : i32
    %c0_i32_1 = arith.constant 0 : i32
    return %c0_i32, %c0_i32_0 : i32, i32
  }
  func.func @transform_8(%arg0: i32) -> (i32, i32) {
    %c0_i32 = arith.constant 0 : i32
    %c0_i32_0 = arith.constant 0 : i32
    %c0_i32_1 = arith.constant 0 : i32
    return %c0_i32, %c0_i32_0 : i32, i32
  }
  func.func @transform_9(%arg0: i32) -> (i32, i32) {
    %c0_i32 = arith.constant 0 : i32
    %c0_i32_0 = arith.constant 0 : i32
    %c0_i32_1 = arith.constant 0 : i32
    return %c0_i32, %c0_i32_0 : i32, i32
  }
  func.func @transform_10(%arg0: i32) -> (i32, i32) {
    %c0_i32 = arith.constant 0 : i32
    %c0_i32_0 = arith.constant 0 : i32
    %c0_i32_1 = arith.constant 0 : i32
    return %c0_i32, %c0_i32_0 : i32, i32
  }
  func.func @transform_11(%arg0: i32) -> (i32, i32) {
    %c0_i32 = arith.constant 0 : i32
    %c0_i32_0 = arith.constant 0 : i32
    %c0_i32_1 = arith.constant 0 : i32
    return %c0_i32, %c0_i32_0 : i32, i32
  }
}

module attributes {stable_mosaic.version = 11 : i64} {
  func.func @_backbone_pool_kernel(%arg0: i32, %arg1: i32, %arg2: i32, %arg3: memref<1x64x9xbf16, #tpu.memory_space<vmem>>, %arg4: memref<9x32xbf16, #tpu.memory_space<vmem>>, %arg5: memref<1x32xf32, #tpu.memory_space<vmem>>, %arg6: memref<32x1280xbf16, #tpu.memory_space<vmem>>, %arg7: memref<1x1280xf32, #tpu.memory_space<vmem>>, %arg8: memref<1x1x1280xf32, #tpu.memory_space<vmem>>) attributes {dimension_semantics = [#tpu.dimension_semantics<parallel>, #tpu.dimension_semantics<parallel>, #tpu.dimension_semantics<arbitrary>], iteration_bounds = array<i64: 2, 1, 1>, scalar_prefetch = 0 : i64, scratch_operands = 0 : i64, tpu.core_type = #tpu.core_type<tc>, window_params = [{transform_indices = @transform_0, window_bounds = array<i64: 1, 64, 9>}, {pipeline_mode = #tpu.pipeline_mode<synchronous>, transform_indices = @transform_1, window_bounds = array<i64: 9, 32>}, {pipeline_mode = #tpu.pipeline_mode<synchronous>, transform_indices = @transform_2, window_bounds = array<i64: 1, 32>}, {pipeline_mode = #tpu.pipeline_mode<synchronous>, transform_indices = @transform_3, window_bounds = array<i64: 32, 1280>}, {pipeline_mode = #tpu.pipeline_mode<synchronous>, transform_indices = @transform_4, window_bounds = array<i64: 1, 1280>}, {transform_indices = @transform_5, window_bounds = array<i64: 1, 1, 1280>}]} {
    %c0_i32 = arith.constant 0 : i32
    %0 = arith.cmpi eq, %arg2, %c0_i32 : i32
    %1 = arith.extui %0 : i1 to i32
    %c0_i32_0 = arith.constant 0 : i32
    %2 = arith.cmpi ne, %1, %c0_i32_0 : i32
    scf.if %2 {
      %cst_25 = arith.constant 0.000000e+00 : f32
      %40 = vector.broadcast %cst_25 : f32 to vector<1x1x1280xf32>
      %c0_26 = arith.constant 0 : index
      %c0_27 = arith.constant 0 : index
      %c0_28 = arith.constant 0 : index
      %41 = vector.load %arg8[%c0_26, %c0_27, %c0_28] : memref<1x1x1280xf32, #tpu.memory_space<vmem>>, vector<1x1x1280xf32>
      tpu.vector_store %arg8[%c0_26, %c0_27, %c0_28], %40 {strides = array<i32>} : memref<1x1x1280xf32, #tpu.memory_space<vmem>>, vector<1x1x1280xf32>,
    } else {
    }
    %c0 = arith.constant 0 : index
    %c0_1 = arith.constant 0 : index
    %c0_2 = arith.constant 0 : index
    %3 = vector.load %arg3[%c0, %c0_1, %c0_2] : memref<1x64x9xbf16, #tpu.memory_space<vmem>>, vector<1x64x9xbf16>
    %4 = vector.shape_cast %3 : vector<1x64x9xbf16> to vector<64x9xbf16>
    %c0_3 = arith.constant 0 : index
    %c0_4 = arith.constant 0 : index
    %5 = vector.load %arg4[%c0_3, %c0_4] : memref<9x32xbf16, #tpu.memory_space<vmem>>, vector<9x32xbf16>
    %cst = arith.constant dense<0.000000e+00> : vector<64x32xf32>
    %6 = tpu.matmul %4, %5, %cst {dimension_numbers = #tpu.dot_dimension_numbers<[1], [0], [0], [1], [0, 0, 1, 1], [], []>} : vector<64x9xbf16>, vector<9x32xbf16>, vector<64x32xf32> -> vector<64x32xf32>
    %c0_5 = arith.constant 0 : index
    %c0_6 = arith.constant 0 : index
    %7 = vector.load %arg5[%c0_5, %c0_6] : memref<1x32xf32, #tpu.memory_space<vmem>>, vector<1x32xf32>
    %8 = vector.broadcast %7 : vector<1x32xf32> to vector<64x32xf32>
    %9 = arith.addf %6, %8 : vector<64x32xf32>
    %cst_7 = arith.constant 5.000000e-01 : f32
    %10 = vector.broadcast %cst_7 : f32 to vector<64x32xf32>
    %11 = arith.mulf %10, %9 : vector<64x32xf32>
    %cst_8 = arith.constant 5.000000e-01 : f32
    %12 = vector.broadcast %cst_8 : f32 to vector<64x32xf32>
    %13 = arith.mulf %12, %9 : vector<64x32xf32>
    %14 = math.tanh %13 : vector<64x32xf32>
    %cst_9 = arith.constant 1.000000e+00 : f32
    %15 = vector.broadcast %cst_9 : f32 to vector<64x32xf32>
    %16 = arith.addf %14, %15 : vector<64x32xf32>
    %17 = arith.mulf %11, %16 : vector<64x32xf32>
    %18 = arith.truncf %17 : vector<64x32xf32> to vector<64x32xbf16>
    %c0_10 = arith.constant 0 : index
    %c0_11 = arith.constant 0 : index
    %19 = vector.load %arg6[%c0_10, %c0_11] : memref<32x1280xbf16, #tpu.memory_space<vmem>>, vector<32x1280xbf16>
    %cst_12 = arith.constant dense<0.000000e+00> : vector<64x1280xf32>
    %20 = tpu.matmul %18, %19, %cst_12 {dimension_numbers = #tpu.dot_dimension_numbers<[1], [0], [0], [1], [0, 0, 1, 1], [], []>} : vector<64x32xbf16>, vector<32x1280xbf16>, vector<64x1280xf32> -> vector<64x1280xf32>
    %c0_13 = arith.constant 0 : index
    %c0_14 = arith.constant 0 : index
    %21 = vector.load %arg7[%c0_13, %c0_14] : memref<1x1280xf32, #tpu.memory_space<vmem>>, vector<1x1280xf32>
    %22 = vector.broadcast %21 : vector<1x1280xf32> to vector<64x1280xf32>
    %23 = arith.addf %20, %22 : vector<64x1280xf32>
    %cst_15 = arith.constant 5.000000e-01 : f32
    %24 = vector.broadcast %cst_15 : f32 to vector<64x1280xf32>
    %25 = arith.mulf %24, %23 : vector<64x1280xf32>
    %26 = math.tanh %25 : vector<64x1280xf32>
    %cst_16 = arith.constant 5.000000e-01 : f32
    %27 = vector.broadcast %cst_16 : f32 to vector<64x1280xf32>
    %28 = arith.mulf %27, %23 : vector<64x1280xf32>
    %cst_17 = arith.constant 1.000000e+00 : f32
    %29 = vector.broadcast %cst_17 : f32 to vector<64x1280xf32>
    %30 = arith.addf %26, %29 : vector<64x1280xf32>
    %31 = arith.mulf %28, %30 : vector<64x1280xf32>
    %c0_18 = arith.constant 0 : index
    %c0_19 = arith.constant 0 : index
    %c0_20 = arith.constant 0 : index
    %32 = vector.load %arg8[%c0_18, %c0_19, %c0_20] : memref<1x1x1280xf32, #tpu.memory_space<vmem>>, vector<1x1x1280xf32>
    %33 = vector.shape_cast %32 : vector<1x1x1280xf32> to vector<1x1280xf32>
    %cst_21 = arith.constant dense<0.000000e+00> : vector<1280xf32>
    %34 = vector.multi_reduction <add>, %31, %cst_21 [0] : vector<64x1280xf32> to vector<1280xf32>
    %35 = vector.shape_cast %34 : vector<1280xf32> to vector<1x1280xf32>
    %36 = arith.addf %33, %35 : vector<1x1280xf32>
    %c0_22 = arith.constant 0 : index
    %c0_23 = arith.constant 0 : index
    %c0_24 = arith.constant 0 : index
    %37 = vector.load %arg8[%c0_22, %c0_23, %c0_24] : memref<1x1x1280xf32, #tpu.memory_space<vmem>>, vector<1x1x1280xf32>
    %38 = vector.shape_cast %37 : vector<1x1x1280xf32> to vector<1x1280xf32>
    %39 = vector.shape_cast %36 : vector<1x1280xf32> to vector<1x1x1280xf32>
    tpu.vector_store %arg8[%c0_22, %c0_23, %c0_24], %39 {strides = array<i32>} : memref<1x1x1280xf32, #tpu.memory_space<vmem>>, vector<1x1x1280xf32>,
    return
  }
  func.func @transform_0(%arg0: i32, %arg1: i32, %arg2: i32) -> (i32, i32, i32) {
    %c1_i32 = arith.constant 1 : i32
    %0 = arith.muli %arg1, %c1_i32 : i32
    %1 = arith.addi %0, %arg2 : i32
    %c0_i32 = arith.constant 0 : i32
    %c0_i32_0 = arith.constant 0 : i32
    return %arg0, %1, %c0_i32 : i32, i32, i32
  }
  func.func @transform_1(%arg0: i32, %arg1: i32, %arg2: i32) -> (i32, i32) {
    %c0_i32 = arith.constant 0 : i32
    %c0_i32_0 = arith.constant 0 : i32
    %c0_i32_1 = arith.constant 0 : i32
    return %c0_i32, %c0_i32_0 : i32, i32
  }
  func.func @transform_2(%arg0: i32, %arg1: i32, %arg2: i32) -> (i32, i32) {
    %c0_i32 = arith.constant 0 : i32
    %c0_i32_0 = arith.constant 0 : i32
    %c0_i32_1 = arith.constant 0 : i32
    return %c0_i32, %c0_i32_0 : i32, i32
  }
  func.func @transform_3(%arg0: i32, %arg1: i32, %arg2: i32) -> (i32, i32) {
    %c0_i32 = arith.constant 0 : i32
    %c0_i32_0 = arith.constant 0 : i32
    %c0_i32_1 = arith.constant 0 : i32
    return %c0_i32, %c0_i32_0 : i32, i32
  }
  func.func @transform_4(%arg0: i32, %arg1: i32, %arg2: i32) -> (i32, i32) {
    %c0_i32 = arith.constant 0 : i32
    %c0_i32_0 = arith.constant 0 : i32
    %c0_i32_1 = arith.constant 0 : i32
    return %c0_i32, %c0_i32_0 : i32, i32
  }
  func.func @transform_5(%arg0: i32, %arg1: i32, %arg2: i32) -> (i32, i32, i32) {
    %c0_i32 = arith.constant 0 : i32
    %c0_i32_0 = arith.constant 0 : i32
    return %arg0, %arg1, %c0_i32 : i32, i32, i32
  }
}

</mosaic_0001>

<bundles_post_ra>
// kernel: multimodal_efficientnet_forward.2
= control target key start
LH: loop header
LB: loop body
LE: loop exit
PB: predicated region body
PF: predicated region fallthrough
CT: control target
= control target key end

     0   :  { %s1881_s18 = smov 0   ;;  %s1883_s19 = smov 0   ;;  %s2483_s0 = inlined_call_operand.vmem [shape: bf16[2,64,9], index: 0, kind: input, shape index: {}]   ;;  %s2484_s1 = inlined_call_operand.vmem [shape: bf16[9,32], index: 1, kind: input, shape index: {}]   ;;  %s2485_s2 = inlined_call_operand.vmem [shape: f32[1,32], index: 2, kind: input, shape index: {}]   ;;  %s2486_s3 = inlined_call_operand.vmem [shape: bf16[32,1280], index: 3, kind: input, shape index: {}]   ;;  %s2487_s4 = inlined_call_operand.vmem [shape: f32[1,1280], index: 4, kind: input, shape index: {}]   ;;  %s2488_s5 = inlined_call_operand.vmem [shape: f32[2,1,1280], index: 5, kind: output, shape index: {}]  }
   0x1   :  { %s1885_s20 = smov 0  }
   0x2 LB: > { %s34_s21 = sadd.s32 1, %s1843_s19  ;;  %p1441_p0 = scmp.ge.s32.totalorder %s1847_s20, 1  ;;  %s1847_s20 = sphi %s1885_s20, %s15_s20   ;;  %s1843_s19 = sphi %s1883_s19, %s2492_s19   ;;  %s1839_s18 = sphi %s1881_s18, %s2491_s18  }
   0x3   : > { %p36_p1 = scmp.ge.s32.totalorder %s34_s21, 2  ;;  %p219_p2 = scmp.lt.s32.totalorder %s1847_s20, 3 }
   0x5   : > { %s2494_s21 = smov (%p36_p1, %s34_s21), 0  ;;  %p220_p3 = pnand %p1441_p0, %p219_p2 }
   0x6   : > { %p257_p4 = scmp.lt.s32.totalorder (!%p220_p3), %s1839_s18, 1 }
   0x7   : > { %223 = sbr.rel (%p220_p3) target bundleno = 524 (0x20c), region = 40 }
   0xc   : > { %v1462_v0 = vld [vmem:[%s2484_s1] sm:$0xf]  ;;  %v1595_v1 = vld [vmem:[%s2484_s1] sm:$0x10]  ;;  %vm338_vm0 = vcmask 1043456   ;;  %vm339_vm1 = vcmask 1044480  }
   0xd   : > { %v1463_v2 = vor.u32 %v1595_v1, %v1462_v0  ;;  %v1849_v3 = vmov 65535   ;;  %s2496_s18 = smov (!%p257_p4, %s1839_s18), 1  ;;  %vm325_vm2 = vcmask 72704   ;;  %v1510_v11 = vld [vmem:[%s2486_s3 + $0x50] sm:$0xf]  ;;  %vm554_vm3 = vcmask 261120  }
   0xe   : > { %v340_v4 = vsel %vm338_vm0, 4294967295, %v1849_v3  ;;  %s1590_s26 = sshll.u32 %s2496_s18, 5  ;;  %v1611_v12 = vld [vmem:[%s2486_s3 + $0x74] sm:$0xf0]  ;;  %v1607_v13 = vld [vmem:[%s2486_s3 + $0x5c] sm:$0xf] }
   0xf   : > { %v341_v5 = vsel %vm339_vm1, %v340_v4, 0  ;;  %s264_s29 = scalar_lea.vmem %s2483_s0, %s1590_s26  ;;  %v1511_v14 = vor.u32 %v1611_v12, %v1510_v11  ;;  %v1520_v15 = vld [vmem:[%s2486_s3 + $0x80] sm:$0xf0]  ;;  %v1470_v17 = vld [vmem:[%s2486_s3] sm:$0xf]  ;;  %vm1327_vm4 = vcmask 1040384  }
  0x10   : > { %v343_v6 = vand.u32 %v1463_v2, %v341_v5  ;;  %v1591_v7 = vld [vmem:[%s264_s29] sm:$0xff]  ;;  %v1592_v8 = vld [vmem:[%s264_s29 + $0x8] sm:$0xff]  ;;  %v1593_v9 = vld [vmem:[%s264_s29 + $0x10] sm:$0xff]  ;;  %v1523_v16 = vor.u32 %v1607_v13, %v1520_v15  ;;  %vm1329_vm5 = vcmask 1042434   ;;  %vm1331_vm6 = vcmask 1041408   ;;  %s1620_s9 = smul.u32 10, %s2496_s18 }
  0x11   : > { %v1594_v10 = vld [vmem:[%s264_s29 + $0x18] sm:$0xff]  ;;  %573 = vmatpush.bf16.msra.mxu1 %v1511_v14  ;;  %1616 = vmatpush.bf16.msra.mxu3 %v1511_v14  ;;  %v1601_v18 = vld [vmem:[%s2486_s3 + $0x24] sm:$0xf0]  ;;  %v1597_v19 = vld [vmem:[%s2486_s3 + $0xc] sm:$0xf]  ;;  %vm1333_vm7 = vcmask 1044484  }
  0x12   : > { %352 = vmatpush.bf16.msra.mxu0 %v343_v6  ;;  %v1471_v20 = vor.u32 %v1601_v18, %v1470_v17  ;;  %v1480_v21 = vld [vmem:[%s2486_s3 + $0x30] sm:$0xf0]  ;;  %v1939_v23 = vld [vmem:[%s2485_s2] ss:$0 sm:$0xff]  ;;  %v1512_v26 = vld [vmem:[%s2486_s3 + $0x78] sm:$0xf0]  ;;  %s2425_s11 = scalar_lea.vmem %s2488_s5, %s1620_s9 }
  0x13   : > { %v1483_v22 = vor.u32 %v1597_v19, %v1480_v21  ;;  %v1606_v25 = vld [vmem:[%s2486_s3 + $0x54] sm:$0xf]  ;;  %v1596_v29 = vld [vmem:[%s2486_s3 + $0x4] sm:$0xf]  ;;  %v1472_v30 = vld [vmem:[%s2486_s3 + $0x28] sm:$0xf0] }
  0x14   : > { %v1515_v28 = vor.u32 %v1606_v25, %v1512_v26  ;;  %v1475_v32 = vor.u32 %v1596_v29, %v1472_v30  ;;  %v1526_v42 = vld [vmem:[%s2486_s3 + $0x60] sm:$0xf]  ;;  %v1613_v43 = vld [vmem:[%s2486_s3 + $0x84] sm:$0xf0]  ;;  %v1486_v48 = vld [vmem:[%s2486_s3 + $0x10] sm:$0xf] }
  0x15   : > { %1464 = vmatmul.msk.bf16.vlgmr.msra.gmra.mxu0 %vm325_vm2, %v1591_v7  ;;  %574 = vmatpush.bf16.msra.mxu1 %v1471_v20  ;;  %v1527_v47 = vor.u32 %v1613_v43, %v1526_v42  ;;  %v1603_v49 = vld [vmem:[%s2486_s3 + $0x34] sm:$0xf0]  ;;  %v1612_v53 = vld [vmem:[%s2486_s3 + $0x7c] sm:$0xf0]  ;;  %v1608_v54 = vld [vmem:[%s2486_s3 + $0x64] sm:$0xf] }
  0x16   : > { %660 = vmatpush.bf16.msrb.mxu0 %v1523_v16  ;;  %1617 = vmatpush.bf16.msra.mxu3 %v1471_v20  ;;  %v1518_v52 = vld [vmem:[%s2486_s3 + $0x58] sm:$0xf]  ;;  %v1528_v57 = vld [vmem:[%s2486_s3 + $0x88] sm:$0xf0]  ;;  %v1487_v60 = vor.u32 %v1603_v49, %v1486_v48  ;;  %v1488_v13 = vld [vmem:[%s2486_s3 + $0x38] sm:$0xf0] }
  0x17   : > { %1618 = vmatpush.bf16.msra.mxu2 %v1515_v28  ;;  %v1519_v56 = vor.u32 %v1612_v53, %v1518_v52  ;;  %v1531_v58 = vor.u32 %v1608_v54, %v1528_v57  ;;  %v1609_v16 = vld [vmem:[%s2486_s3 + $0x6c] sm:$0xf]  ;;  %v1536_v17 = vld [vmem:[%s2486_s3 + $0x90] sm:$0xf0]  ;;  %v1599_v19 = vld [vmem:[%s2486_s3 + $0x1c] sm:$0xf] }
  0x18   : > { %v1539_v18 = vor.u32 %v1609_v16, %v1536_v17  ;;  %v1496_v20 = vld [vmem:[%s2486_s3 + $0x40] sm:$0xf0]  ;;  %v1615_v42 = vld [vmem:[%s2486_s3 + $0x94] sm:$0xf0]  ;;  %v1502_v52 = vld [vmem:[%s2486_s3 + $0x20] sm:$0xf] }
  0x19   : > { %602 = vmatpush.bf16.msrb.mxu1 %v1515_v28  ;;  %v1499_v21 = vor.u32 %v1599_v19, %v1496_v20  ;;  %v1605_v53 = vld [vmem:[%s2486_s3 + $0x44] sm:$0xf0]  ;;  %v1600_v57 = vld [vmem:[%s2486_s3 + $0x24] sm:$0xf]  ;;  %vm1335_vm9 = vcmask 1046534   ;;  %vm1337_vm10 = vcmask 1045508  }
  0x1a   : > { %661 = vmatpush.bf16.msrb.mxu0 %v1483_v22  ;;  %631 = vmatpush.bf16.msrb.mxu3 %v1519_v56  ;;  %v1503_v54 = vor.u32 %v1605_v53, %v1502_v52  ;;  %v1604_v56 = vld [vmem:[%s2486_s3 + $0x3c] sm:$0xf0] }
  0x1b   : > { %1619 = vmatpush.bf16.msra.mxu2 %v1475_v32 }
  0x1d   : > { %603 = vmatpush.bf16.msrb.mxu1 %v1475_v32 }
  0x1e   : > { %776 = vmatpush.bf16.msra.mxu0 %v1539_v18 }
  0x1f   : > { %718 = vmatpush.bf16.msrb.mxu2 %v1531_v58 }
  0x22   : > { %777 = vmatpush.bf16.msra.mxu0 %v1499_v21 }
  0x25   : > { %1465 = vmatmul.msk.bf16.gmra.mxu0 %vm325_vm2, %v1592_v8  ;;  %v1478_v8 = vld [vmem:[%s2486_s3 + $0x8] sm:$0xf] }
  0x35   : > { %1466 = vmatmul.msk.bf16.gmra.mxu0 %vm325_vm2, %v1593_v9  ;;  %v1602_v9 = vld [vmem:[%s2486_s3 + $0x2c] sm:$0xf0] }
  0x36   : > { %v1479_v12 = vor.u32 %v1602_v9, %v1478_v8 }
  0x38   : > { %632 = vmatpush.bf16.msrb.mxu3 %v1479_v12 }
  0x45   : > { %1467 = vmatmul.msk.bf16.gmra.mxu0 %vm325_vm2, %v1594_v10  ;;  %v1598_v10 = vld [vmem:[%s2486_s3 + $0x14] sm:$0xf] }
  0x46   : > { %v1491_v14 = vor.u32 %v1598_v10, %v1488_v13 }
  0x48   : > { %719 = vmatpush.bf16.msrb.mxu2 %v1491_v14 }
  0x92   : > { %v354_v24 = vpop.f32.mrf.mxu0 }
  0x93   : > { %v355_v27 = vadd.f32 %v1939_v23, %v354_v24 }
  0x95   : > { %v374_v31 = vmul.f32 0.5, %v355_v27 }
  0x97   : > { %1648 = vtanh.f32 %v374_v31 }
  0x9a   : > { %v356_v33 = vpop.f32.mrf.mxu0 }
  0x9b   : > { %v357_v34 = vadd.f32 %v1939_v23, %v356_v33 }
  0x9d   : > { %v375_v35 = vmul.f32 0.5, %v357_v34  ;;  %v1649_v36 = vpop.eup %1648 }
  0x9e   : > { %v390_v39 = vadd.f32 1.0, %v1649_v36  ;;  %v1534_v36 = vld [vmem:[%s2486_s3 + $0x68] sm:$0xf] }
  0x9f   : > { %1650 = vtanh.f32 %v375_v35 }
  0xa0   : > { %v398_v45 = vmul.f32 %v390_v39, %v374_v31  ;;  %v1544_v39 = vld [vmem:[%s2486_s3 + $0x98] sm:$0xf0] }
  0xa2   : > { %v359_v37 = vpop.f32.mrf.mxu0 }
  0xa3   : > { %v360_v38 = vadd.f32 %v1939_v23, %v359_v37 }
  0xa5   : > { %v1651_v40 = vpop.eup %1650  ;;  %v376_v44 = vmul.f32 0.5, %v360_v38  ;;  %v1610_v38 = vld [vmem:[%s2486_s3 + $0x74] sm:$0xf] }
  0xa6   : > { %v391_v41 = vadd.f32 1.0, %v1651_v40  ;;  %v1547_v40 = vor.u32 %v1610_v38, %v1544_v39 }
  0xa7   : > { %1652 = vtanh.f32 %v376_v44 }
  0xa8   : > { %v399_v46 = vmul.f32 %v391_v41, %v375_v35  ;;  %v1542_v41 = vld [vmem:[%s2486_s3 + $0x70] sm:$0xf] }
  0xa9   : > { %v1543_v43 = vor.u32 %v1615_v42, %v1542_v41 }
  0xaa   : > { %v1968_v50 = vpack.c.bf16 %v399_v46, %v398_v45  ;;  %v361_v51 = vpop.f32.mrf.mxu0 }
  0xab   : > { %v362_v55 = vadd.f32 %v1939_v23, %v361_v51 }
  0xac   : > { %1548 = vmatmul.msk.bf16.vlgmr.msra.gmra.mxu1 %vm554_vm3, %v1968_v50  ;;  %1560 = vmatmul.msk.bf16.vlgmr.msrb.gmra.mxu0 %vm554_vm3, %v1968_v50 }
  0xad   : > { %v377_v59 = vmul.f32 0.5, %v362_v55  ;;  %689 = vmatpush.bf16.msra.mxu1 %v1527_v47  ;;  %v1653_v61 = vpop.eup %1652  ;;  %v1494_v55 = vld [vmem:[%s2486_s3 + $0x18] sm:$0xf] }
  0xae   : > { %v392_v0 = vadd.f32 1.0, %v1653_v61  ;;  %v1495_v58 = vor.u32 %v1604_v56, %v1494_v55  ;;  %v2116_v61 = vld [vmem:[%s2487_s4] sm:$0xff] }
  0xaf   : > { %1654 = vtanh.f32 %v377_v59  ;;  %v2135_v13 = vperm.slane %v2116_v61, 1 }
  0xb0   : > { %v400_v4 = vmul.f32 %v392_v0, %v376_v44 }
  0xb1   : > { %690 = vmatpush.bf16.msra.mxu1 %v1487_v60 }
  0xb2   : > { %v364_v62 = vpop.f32.mrf.mxu0 }
  0xb3   : > { %v365_v63 = vadd.f32 %v1939_v23, %v364_v62  ;;  %v2119_v62 = vperm.slane %v2116_v61, 0 }
  0xb5   : > { %v1655_v1 = vpop.eup %1654  ;;  %v378_v3 = vmul.f32 0.5, %v365_v63  ;;  %v2122_v63 = vperm.slane %v2116_v61, 3 }
  0xb6   : > { %v393_v2 = vadd.f32 1.0, %v1655_v1 }
  0xb7   : > { %1656 = vtanh.f32 %v378_v3 }
  0xb8   : > { %v401_v5 = vmul.f32 %v393_v2, %v377_v59  ;;  %v1504_v59 = vld [vmem:[%s2486_s3 + $0x48] sm:$0xf0] }
  0xb9   : > { %v1507_v60 = vor.u32 %v1600_v57, %v1504_v59 }
  0xba   : > { %v1988_v6 = vpack.c.bf16 %v401_v5, %v400_v4  ;;  %v366_v7 = vpop.f32.mrf.mxu0 }
  0xbb   : > { %v367_v11 = vadd.f32 %v1939_v23, %v366_v7 }
  0xbc   : > { %1549 = vmatmul.msk.bf16.vlgmr.msra.gmra.mxu3 %vm554_vm3, %v1988_v6  ;;  %1552 = vmatmul.msk.bf16.vlgmr.msrb.gmra.mxu1 %vm554_vm3, %v1968_v50 }
  0xbd   : > { %v379_v15 = vmul.f32 0.5, %v367_v11  ;;  %1553 = vmatmul.msk.bf16.vlgmr.msra.gmra.mxu2 %vm554_vm3, %v1988_v6  ;;  %1561 = vmatmul.msk.bf16.gmra.mxu0 %vm554_vm3, %v1988_v6  ;;  %v1657_v22 = vpop.eup %1656 }
  0xbe   : > { %v394_v26 = vadd.f32 1.0, %v1657_v22  ;;  %834 = vmatpush.bf16.msra.mxu2 %v1547_v40  ;;  %805 = vmatpush.bf16.msrb.mxu1 %v1543_v43 }
  0xbf   : > { %1658 = vtanh.f32 %v379_v15 }
  0xc0   : > { %v402_v30 = vmul.f32 %v394_v26, %v378_v3 }
  0xc2   : > { %v369_v24 = vpop.f32.mrf.mxu0  ;;  %806 = vmatpush.bf16.msrb.mxu1 %v1503_v54  ;;  %835 = vmatpush.bf16.msra.mxu2 %v1507_v60 }
  0xc3   : > { %v370_v25 = vadd.f32 %v1939_v23, %v369_v24 }
  0xc5   : > { %v1659_v27 = vpop.eup %1658  ;;  %v380_v29 = vmul.f32 0.5, %v370_v25 }
  0xc6   : > { %v395_v28 = vadd.f32 1.0, %v1659_v27 }
  0xc7   : > { %1660 = vtanh.f32 %v380_v29 }
  0xc8   : > { %v403_v31 = vmul.f32 %v395_v28, %v379_v15 }
  0xca   : > { %v2024_v32 = vpack.c.bf16 %v403_v31, %v402_v30  ;;  %v371_v33 = vpop.f32.mrf.mxu0 }
  0xcb   : > { %v372_v34 = vadd.f32 %v1939_v23, %v371_v33  ;;  %v1614_v23 = vld [vmem:[%s2486_s3 + $0x8c] sm:$0xf0] }
  0xcc   : > { %1550 = vmatmul.msk.bf16.gmra.mxu3 %vm554_vm3, %v2024_v32  ;;  %1564 = vmatmul.msk.bf16.vlgmr.msra.gmra.mxu1 %vm554_vm3, %v1968_v50  ;;  %v1535_v37 = vor.u32 %v1614_v23, %v1534_v36 }
  0xcd   : > { %v381_v35 = vmul.f32 0.5, %v372_v34  ;;  %1554 = vmatmul.msk.bf16.gmra.mxu2 %vm554_vm3, %v2024_v32  ;;  %1562 = vmatmul.msk.bf16.gmra.mxu0 %vm554_vm3, %v2024_v32  ;;  %v1661_v44 = vpop.eup %1660 }
  0xce   : > { %747 = vmatpush.bf16.msra.mxu3 %v1535_v37  ;;  %v396_v45 = vadd.f32 1.0, %v1661_v44 }
  0xcf   : > { %1662 = vtanh.f32 %v381_v35 }
  0xd0   : > { %v404_v48 = vmul.f32 %v396_v45, %v380_v29 }
  0xd2   : > { %748 = vmatpush.bf16.msra.mxu3 %v1495_v58 }
  0xd5   : > { %v1663_v46 = vpop.eup %1662 }
  0xd6   : > { %v397_v47 = vadd.f32 1.0, %v1663_v46 }
  0xd8   : > { %v405_v49 = vmul.f32 %v397_v47, %v381_v35  ;;  %v2150_v47 = vperm.slane %v2116_v61, 4 }
  0xda   : > { %v2053_v51 = vpack.c.bf16 %v405_v49, %v404_v48 }
  0xdc   : > { %1551 = vmatmul.msk.bf16.gmra.mxu3 %vm554_vm3, %v2053_v51  ;;  %1565 = vmatmul.msk.bf16.gmra.mxu1 %vm554_vm3, %v1988_v6 }
  0xdd   : > { %1555 = vmatmul.msk.bf16.gmra.mxu2 %vm554_vm3, %v2053_v51  ;;  %1563 = vmatmul.msk.bf16.gmra.mxu0 %vm554_vm3, %v2053_v51 }
  0xec   : > { %1556 = vmatmul.msk.bf16.vlgmr.msrb.gmra.mxu3 %vm554_vm3, %v1968_v50  ;;  %1566 = vmatmul.msk.bf16.gmra.mxu1 %vm554_vm3, %v2024_v32 }
  0xed   : > { %1568 = vmatmul.msk.bf16.vlgmr.msrb.gmra.mxu2 %vm554_vm3, %v1968_v50  ;;  %1576 = vmatmul.msk.bf16.vlgmr.msra.gmra.mxu0 %vm554_vm3, %v1968_v50 }
  0xfc   : > { %1557 = vmatmul.msk.bf16.gmra.mxu3 %vm554_vm3, %v1988_v6  ;;  %1567 = vmatmul.msk.bf16.gmra.mxu1 %vm554_vm3, %v2053_v51 }
  0xfd   : > { %1569 = vmatmul.msk.bf16.gmra.mxu2 %vm554_vm3, %v1988_v6  ;;  %1577 = vmatmul.msk.bf16.gmra.mxu0 %vm554_vm3, %v1988_v6 }
 0x10c   : > { %1558 = vmatmul.msk.bf16.gmra.mxu3 %vm554_vm3, %v2024_v32  ;;  %1580 = vmatmul.msk.bf16.vlgmr.msrb.gmra.mxu1 %vm554_vm3, %v1968_v50 }
 0x10d   : > { %1570 = vmatmul.msk.bf16.gmra.mxu2 %vm554_vm3, %v2024_v32  ;;  %1578 = vmatmul.msk.bf16.gmra.mxu0 %vm554_vm3, %v2024_v32 }
 0x11c   : > { %1559 = vmatmul.msk.bf16.gmra.mxu3 %vm554_vm3, %v2053_v51  ;;  %1581 = vmatmul.msk.bf16.gmra.mxu1 %vm554_vm3, %v1988_v6 }
 0x11d   : > { %1571 = vmatmul.msk.bf16.gmra.mxu2 %vm554_vm3, %v2053_v51  ;;  %1579 = vmatmul.msk.bf16.gmra.mxu0 %vm554_vm3, %v2053_v51 }
 0x129   : > { %v576_v0 = vpop.f32.mrf.mxu1  ;;  %v663_v1 = vpop.f32.mrf.mxu0 }
 0x12a   : > { %v577_v2 = vadd.f32 %v576_v0, %v2119_v62  ;;  %v664_v3 = vadd.f32 %v663_v1, %v2122_v63 }
 0x12c   : > { %1572 = vmatmul.msk.bf16.vlgmr.msra.gmra.mxu3 %vm554_vm3, %v1968_v50  ;;  %1582 = vmatmul.msk.bf16.gmra.mxu1 %vm554_vm3, %v2024_v32  ;;  %v857_v4 = vmul.f32 0.5, %v577_v2  ;;  %v860_v5 = vmul.f32 0.5, %v664_v3 }
 0x12d   : > { %1584 = vmatmul.msk.bf16.vlgmr.msra.gmra.mxu2 %vm554_vm3, %v1968_v50 }
 0x12e   : > { %1664 = vtanh.f32 %v857_v4 }
 0x12f   : > { %1666 = vtanh.f32 %v860_v5 }
 0x131   : > { %v578_v7 = vpop.f32.mrf.mxu1  ;;  %v665_v8 = vpop.f32.mrf.mxu0 }
 0x132   : > { %v579_v9 = vadd.f32 %v578_v7, %v2119_v62  ;;  %v666_v10 = vadd.f32 %v665_v8, %v2122_v63 }
 0x134   : > { %v867_v11 = vmul.f32 0.5, %v579_v9  ;;  %v870_v12 = vmul.f32 0.5, %v666_v10  ;;  %v1665_v14 = vpop.eup %1664 }
 0x135   : > { %v1667_v15 = vpop.eup %1666  ;;  %v1017_v18 = vadd.f32 1.0, %v1665_v14 }
 0x136   : > { %1668 = vtanh.f32 %v867_v11  ;;  %v1020_v21 = vadd.f32 1.0, %v1667_v15 }
 0x137   : > { %1670 = vtanh.f32 %v870_v12  ;;  %v1097_v28 = vmul.f32 %v1017_v18, %v857_v4 }
 0x138   : > { %v1100_v31 = vmul.f32 %v1020_v21, %v860_v5 }
 0x139   : > { %v605_v50 = vpop.f32.mrf.mxu1 }
 0x13a   : > { %v606_v16 = vadd.f32 %v605_v50, %v2135_v13  ;;  %v668_v17 = vpop.f32.mrf.mxu0 }
 0x13b   : > { %v669_v19 = vadd.f32 %v668_v17, %v2122_v63 }
 0x13c   : > { %v1669_v20 = vpop.eup %1668  ;;  %1573 = vmatmul.msk.bf16.gmra.mxu3 %vm554_vm3, %v1988_v6  ;;  %1583 = vmatmul.msk.bf16.gmra.mxu1 %vm554_vm3, %v2053_v51  ;;  %v858_v27 = vmul.f32 0.5, %v606_v16 }
 0x13d   : > { %v1671_v22 = vpop.eup %1670  ;;  %v1027_v24 = vadd.f32 1.0, %v1669_v20  ;;  %v880_v25 = vmul.f32 0.5, %v669_v19  ;;  %1585 = vmatmul.msk.bf16.gmra.mxu2 %vm554_vm3, %v1988_v6 }
 0x13e   : > { %v1030_v26 = vadd.f32 1.0, %v1671_v22 }
 0x13f   : > { %v1107_v29 = vmul.f32 %v1027_v24, %v867_v11  ;;  %1672 = vtanh.f32 %v880_v25  ;;  %v581_v30 = vpop.f32.mrf.mxu3 }
 0x140   : > { %v1110_v33 = vmul.f32 %v1030_v26, %v870_v12  ;;  %v582_v34 = vadd.f32 %v581_v30, %v2119_v62  ;;  %v610_v35 = vpop.f32.mrf.mxu2  ;;  %1674 = vtanh.f32 %v858_v27 }
 0x141   : > { %v1179_v36 = vadd.f32 %v1107_v29, %v1097_v28  ;;  %v611_v23 = vadd.f32 %v610_v35, %v2135_v13  ;;  %v607_v37 = vpop.f32.mrf.mxu1 }
 0x142   : > { %v1218_v38 = vadd.f32 %v1110_v33, %v1100_v31  ;;  %v877_v39 = vmul.f32 0.5, %v582_v34  ;;  %v608_v6 = vadd.f32 %v607_v37, %v2135_v13  ;;  %v670_v40 = vpop.f32.mrf.mxu0 }
 0x143   : > { %v878_v41 = vmul.f32 0.5, %v611_v23  ;;  %v671_v42 = vadd.f32 %v670_v40, %v2122_v63 }
 0x144   : > { %1676 = vtanh.f32 %v877_v39  ;;  %v868_v43 = vmul.f32 0.5, %v608_v6 }
 0x145   : > { %v1673_v44 = vpop.eup %1672  ;;  %1678 = vtanh.f32 %v878_v41  ;;  %v890_v45 = vmul.f32 0.5, %v671_v42 }
 0x146   : > { %v1040_v46 = vadd.f32 1.0, %v1673_v44  ;;  %1680 = vtanh.f32 %v868_v43  ;;  %v1675_v49 = vpop.eup %1674 }
 0x147   : > { %1682 = vtanh.f32 %v890_v45  ;;  %v583_v48 = vpop.f32.mrf.mxu3  ;;  %v1018_v2 = vadd.f32 1.0, %v1675_v49 }
 0x148   : > { %v1120_v52 = vmul.f32 %v1040_v46, %v880_v25  ;;  %v584_v53 = vadd.f32 %v583_v48, %v2119_v62  ;;  %v612_v54 = vpop.f32.mrf.mxu2 }
 0x149   : > { %v613_v55 = vadd.f32 %v612_v54, %v2135_v13  ;;  %v692_v56 = vpop.f32.mrf.mxu1  ;;  %v1098_v50 = vmul.f32 %v1018_v2, %v858_v27 }
 0x14a   : > { %v1677_v57 = vpop.eup %1676  ;;  %v1219_v58 = vadd.f32 %v1218_v38, %v1120_v52  ;;  %v887_v59 = vmul.f32 0.5, %v584_v53  ;;  %v673_v60 = vpop.f32.mrf.mxu0  ;;  %v693_v0 = vadd.f32 %v692_v56, %v2150_v47 }
 0x14b   : > { %v1679_v1 = vpop.eup %1678  ;;  %v1037_v3 = vadd.f32 1.0, %v1677_v57  ;;  %v888_v4 = vmul.f32 0.5, %v613_v55  ;;  %v674_v5 = vadd.f32 %v673_v60, %v2122_v63 }
 0x14c   : > { %v1681_v7 = vpop.eup %1680  ;;  %v1038_v8 = vadd.f32 1.0, %v1679_v1  ;;  %1684 = vtanh.f32 %v887_v59  ;;  %1574 = vmatmul.msk.bf16.gmra.mxu3 %vm554_vm3, %v2024_v32  ;;  %v2160_v15 = vmul.f32 0.5, %v693_v0 }
 0x14d   : > { %v1683_v9 = vpop.eup %1682  ;;  %v1117_v10 = vmul.f32 %v1037_v3, %v877_v39  ;;  %v1028_v11 = vadd.f32 1.0, %v1681_v7  ;;  %1686 = vtanh.f32 %v888_v4  ;;  %v900_v12 = vmul.f32 0.5, %v674_v5  ;;  %1586 = vmatmul.msk.bf16.gmra.mxu2 %vm554_vm3, %v2024_v32 }
 0x14e   : > { %v1050_v14 = vadd.f32 1.0, %v1683_v9  ;;  %v1118_v22 = vmul.f32 %v1038_v8, %v878_v41 }
 0x14f   : > { %v1180_v16 = vadd.f32 %v1179_v36, %v1117_v10  ;;  %v1108_v17 = vmul.f32 %v1028_v11, %v868_v43  ;;  %1688 = vtanh.f32 %v900_v12  ;;  %v586_v18 = vpop.f32.mrf.mxu3 }
 0x150   : > { %v1130_v19 = vmul.f32 %v1050_v14, %v890_v45  ;;  %v587_v20 = vadd.f32 %v586_v18, %v2119_v62  ;;  %v615_v21 = vpop.f32.mrf.mxu2  ;;  %1690 = vtanh.f32 %v2160_v15 }
 0x151   : > { %v1192_v24 = vadd.f32 %v1108_v17, %v1098_v50  ;;  %v616_v25 = vadd.f32 %v615_v21, %v2135_v13  ;;  %v694_v26 = vpop.f32.mrf.mxu1 }
 0x152   : > { %v1685_v28 = vpop.eup %1684  ;;  %v1220_v29 = vadd.f32 %v1219_v58, %v1130_v19  ;;  %v897_v32 = vmul.f32 0.5, %v587_v20  ;;  %v675_v30 = vpop.f32.mrf.mxu0  ;;  %v695_v27 = vadd.f32 %v694_v26, %v2150_v47 }
 0x153   : > { %v1687_v31 = vpop.eup %1686  ;;  %v1047_v33 = vadd.f32 1.0, %v1685_v28  ;;  %v1193_v34 = vadd.f32 %v1192_v24, %v1118_v22  ;;  %v898_v35 = vmul.f32 0.5, %v616_v25  ;;  %v676_v36 = vadd.f32 %v675_v30, %v2122_v63 }
 0x154   : > { %v1048_v23 = vadd.f32 1.0, %v1687_v31  ;;  %1692 = vtanh.f32 %v897_v32  ;;  %v871_v37 = vmul.f32 0.5, %v695_v27 }
 0x155   : > { %v1689_v38 = vpop.eup %1688  ;;  %v1127_v39 = vmul.f32 %v1047_v33, %v887_v59  ;;  %1694 = vtanh.f32 %v898_v35  ;;  %v910_v6 = vmul.f32 0.5, %v676_v36 }
 0x156   : > { %v1128_v40 = vmul.f32 %v1048_v23, %v888_v4  ;;  %v1060_v41 = vadd.f32 1.0, %v1689_v38  ;;  %1696 = vtanh.f32 %v871_v37  ;;  %v1691_v44 = vpop.eup %1690 }
 0x157   : > { %v1181_v42 = vadd.f32 %v1180_v16, %v1127_v39  ;;  %1698 = vtanh.f32 %v910_v6  ;;  %v588_v43 = vpop.f32.mrf.mxu3  ;;  %v1021_v60 = vadd.f32 1.0, %v1691_v44 }
 0x158   : > { %v1194_v45 = vadd.f32 %v1193_v34, %v1128_v40  ;;  %v1140_v46 = vmul.f32 %v1060_v41, %v900_v12  ;;  %v589_v48 = vadd.f32 %v588_v43, %v2119_v62  ;;  %v617_v49 = vpop.f32.mrf.mxu2 }
 0x159   : > { %v618_v52 = vadd.f32 %v617_v49, %v2135_v13  ;;  %v697_v53 = vpop.f32.mrf.mxu1  ;;  %v1101_v14 = vmul.f32 %v1021_v60, %v2160_v15 }
 0x15a   : > { %v1693_v54 = vpop.eup %1692  ;;  %v1221_v55 = vadd.f32 %v1220_v29, %v1140_v46  ;;  %v907_v56 = vmul.f32 0.5, %v589_v48  ;;  %v678_v57 = vpop.f32.mrf.mxu0  ;;  %v698_v58 = vadd.f32 %v697_v53, %v2150_v47 }
 0x15b   : > { %v1695_v59 = vpop.eup %1694  ;;  %v1057_v0 = vadd.f32 1.0, %v1693_v54  ;;  %v908_v1 = vmul.f32 0.5, %v618_v52  ;;  %v679_v2 = vadd.f32 %v678_v57, %v2122_v63 }
 0x15c   : > { %v1697_v3 = vpop.eup %1696  ;;  %v1058_v4 = vadd.f32 1.0, %v1695_v59  ;;  %1700 = vtanh.f32 %v907_v56  ;;  %v881_v5 = vmul.f32 0.5, %v698_v58  ;;  %1575 = vmatmul.msk.bf16.gmra.mxu3 %vm554_vm3, %v2053_v51 }
 0x15d   : > { %v1699_v7 = vpop.eup %1698  ;;  %v1137_v8 = vmul.f32 %v1057_v0, %v897_v32  ;;  %v1031_v9 = vadd.f32 1.0, %v1697_v3  ;;  %1702 = vtanh.f32 %v908_v1  ;;  %v920_v10 = vmul.f32 0.5, %v679_v2  ;;  %1587 = vmatmul.msk.bf16.gmra.mxu2 %vm554_vm3, %v2053_v51 }
 0x15e   : > { %v1138_v11 = vmul.f32 %v1058_v4, %v898_v35  ;;  %v1070_v12 = vadd.f32 1.0, %v1699_v7  ;;  %1704 = vtanh.f32 %v881_v5 }
 0x15f   : > { %v1182_v50 = vadd.f32 %v1181_v42, %v1137_v8  ;;  %v1111_v16 = vmul.f32 %v1031_v9, %v871_v37  ;;  %1706 = vtanh.f32 %v920_v10  ;;  %v591_v17 = vpop.f32.mrf.mxu3 }
 0x160   : > { %v1195_v18 = vadd.f32 %v1194_v45, %v1138_v11  ;;  %v1150_v19 = vmul.f32 %v1070_v12, %v910_v6  ;;  %v592_v20 = vadd.f32 %v591_v17, %v2119_v62  ;;  %v620_v21 = vpop.f32.mrf.mxu2 }
 0x161   : > { %v1231_v22 = vadd.f32 %v1111_v16, %v1101_v14  ;;  %v621_v24 = vadd.f32 %v620_v21, %v2135_v13  ;;  %v699_v25 = vpop.f32.mrf.mxu1 }
 0x162   : > { %v1701_v26 = vpop.eup %1700  ;;  %v1222_v51 = vadd.f32 %v1221_v55, %v1150_v19  ;;  %v917_v28 = vmul.f32 0.5, %v592_v20  ;;  %v680_v29 = vpop.f32.mrf.mxu0  ;;  %v700_v32 = vadd.f32 %v699_v25, %v2150_v47 }
 0x163   : > { %v1703_v15 = vpop.eup %1702  ;;  %v1067_v30 = vadd.f32 1.0, %v1701_v26  ;;  %v918_v27 = vmul.f32 0.5, %v621_v24  ;;  %v681_v31 = vadd.f32 %v680_v29, %v2122_v63 }
 0x164   : > { %v1705_v33 = vpop.eup %1704  ;;  %v1068_v34 = vadd.f32 1.0, %v1703_v15  ;;  %1708 = vtanh.f32 %v917_v28  ;;  %v891_v35 = vmul.f32 0.5, %v700_v32 }
 0x165   : > { %v1707_v36 = vpop.eup %1706  ;;  %v1147_v23 = vmul.f32 %v1067_v30, %v907_v56  ;;  %v1041_v37 = vadd.f32 1.0, %v1705_v33  ;;  %1710 = vtanh.f32 %v918_v27  ;;  %v930_v38 = vmul.f32 0.5, %v681_v31 }
 0x166   : > { %v1148_v39 = vmul.f32 %v1068_v34, %v908_v1  ;;  %v1080_v6 = vadd.f32 1.0, %v1707_v36  ;;  %1712 = vtanh.f32 %v891_v35  ;;  %v2184_v1 = vperm.slane %v2116_v61, 2 }
 0x167   : > { %v1183_v40 = vadd.f32 %v1182_v50, %v1147_v23  ;;  %v1121_v41 = vmul.f32 %v1041_v37, %v881_v5  ;;  %1714 = vtanh.f32 %v930_v38  ;;  %v593_v42 = vpop.f32.mrf.mxu3 }
 0x168   : > { %v1196_v43 = vadd.f32 %v1195_v18, %v1148_v39  ;;  %v1160_v44 = vmul.f32 %v1080_v6, %v920_v10  ;;  %v594_v63 = vadd.f32 %v593_v42, %v2119_v62  ;;  %v622_v45 = vpop.f32.mrf.mxu2 }
 0x169   : > { %v1232_v46 = vadd.f32 %v1231_v22, %v1121_v41  ;;  %v623_v48 = vadd.f32 %v622_v45, %v2135_v13  ;;  %v702_v49 = vpop.f32.mrf.mxu1  ;;  %v2187_v13 = vperm.slane %v2116_v61, 5 }
 0x16a   : > { %v1709_v52 = vpop.eup %1708  ;;  %v1223_v53 = vadd.f32 %v1222_v51, %v1160_v44  ;;  %v927_v54 = vmul.f32 0.5, %v594_v63  ;;  %v703_v55 = vadd.f32 %v702_v49, %v2150_v47  ;;  %v2197_v63 = vpop.f32.mrf.mxu0 }
 0x16b   : > { %v1711_v56 = vpop.eup %1710  ;;  %v1077_v57 = vadd.f32 1.0, %v1709_v52  ;;  %v928_v58 = vmul.f32 0.5, %v623_v48 }
 0x16c   : > { %v1713_v59 = vpop.eup %1712  ;;  %v1078_v60 = vadd.f32 1.0, %v1711_v56  ;;  %1716 = vtanh.f32 %v927_v54  ;;  %v901_v0 = vmul.f32 0.5, %v703_v55 }
 0x16d   : > { %v1715_v62 = vpop.eup %1714  ;;  %v1157_v2 = vmul.f32 %v1077_v57, %v917_v28  ;;  %v1051_v3 = vadd.f32 1.0, %v1713_v59  ;;  %1718 = vtanh.f32 %v928_v58 }
 0x16e   : > { %v1158_v4 = vmul.f32 %v1078_v60, %v918_v27  ;;  %v1090_v5 = vadd.f32 1.0, %v1715_v62  ;;  %1720 = vtanh.f32 %v901_v0 }
 0x16f   : > { %v1184_v7 = vadd.f32 %v1183_v40, %v1157_v2  ;;  %v1131_v8 = vmul.f32 %v1051_v3, %v891_v35  ;;  %v634_v9 = vpop.f32.mrf.mxu3 }
 0x170   : > { %v1197_v10 = vadd.f32 %v1196_v43, %v1158_v4  ;;  %v1170_v11 = vmul.f32 %v1090_v5, %v930_v38  ;;  %v635_v12 = vadd.f32 %v634_v9, %v2184_v1  ;;  %v721_v14 = vpop.f32.mrf.mxu2 }
 0x171   : > { %v1233_v50 = vadd.f32 %v1232_v46, %v1131_v8  ;;  %v722_v16 = vadd.f32 %v721_v14, %v2187_v13  ;;  %v704_v17 = vpop.f32.mrf.mxu1 }
 0x172   : > { %v1717_v18 = vpop.eup %1716  ;;  %v2191_v19 = vadd.f32 %v1223_v53, %v1170_v11  ;;  %v705_v20 = vadd.f32 %v704_v17, %v2150_v47  ;;  %v859_v26 = vmul.f32 0.5, %v635_v12 }
 0x173   : > { %v1719_v21 = vpop.eup %1718  ;;  %v1087_v22 = vadd.f32 1.0, %v1717_v18  ;;  %v862_v32 = vmul.f32 0.5, %v722_v16 }
 0x174   : > { %v1721_v24 = vpop.eup %1720  ;;  %v1088_v25 = vadd.f32 1.0, %v1719_v21  ;;  %v911_v51 = vmul.f32 0.5, %v705_v20  ;;  %v2201_v21 = vpop.f32.mrf.mxu0 }
 0x175   : > { %v1167_v28 = vmul.f32 %v1087_v22, %v927_v54  ;;  %v1061_v29 = vadd.f32 1.0, %v1721_v24 }
 0x176   : > { %v1168_v15 = vmul.f32 %v1088_v25, %v928_v58  ;;  %1722 = vtanh.f32 %v911_v51 }
 0x177   : > { %v1185_v30 = vadd.f32 %v1184_v7, %v1167_v28  ;;  %v1141_v27 = vmul.f32 %v1061_v29, %v901_v0  ;;  %v636_v31 = vpop.f32.mrf.mxu3  ;;  %1724 = vtanh.f32 %v859_v26 }
 0x178   : > { %v1198_v33 = vadd.f32 %v1197_v10, %v1168_v15  ;;  %v637_v34 = vadd.f32 %v636_v31, %v2184_v1  ;;  %v723_v35 = vpop.f32.mrf.mxu2  ;;  %1726 = vtanh.f32 %v862_v32 }
 0x179   : > { %v1186_v36 = vrot.slane %v1185_v30, 4  ;;  %v1234_v23 = vadd.f32 %v1233_v50, %v1141_v27  ;;  %v724_v37 = vadd.f32 %v723_v35, %v2187_v13  ;;  %v707_v38 = vpop.f32.mrf.mxu1 }
 0x17a   : > { %v1199_v39 = vrot.slane %v1198_v33, 4  ;;  %v869_v6 = vmul.f32 0.5, %v637_v34  ;;  %v708_v42 = vadd.f32 %v707_v38, %v2150_v47 }
 0x17b   : > { %v1187_v40 = vadd.f32 %v1186_v36, %v1185_v30  ;;  %v872_v41 = vmul.f32 0.5, %v724_v37 }
 0x17c   : > { %v1723_v43 = vpop.eup %1722  ;;  %v1200_v44 = vadd.f32 %v1199_v39, %v1198_v33  ;;  %1728 = vtanh.f32 %v869_v6  ;;  %v921_v55 = vmul.f32 0.5, %v708_v42  ;;  %v2212_v42 = vpop.f32.mrf.mxu0 }
 0x17d   : > { %v1188_v45 = vrot.slane %v1187_v40, 2  ;;  %v1071_v46 = vadd.f32 1.0, %v1723_v43  ;;  %1730 = vtanh.f32 %v872_v41  ;;  %v1725_v48 = vpop.eup %1724 }
 0x17e   : > { %v1201_v49 = vrot.slane %v1200_v44, 2  ;;  %v1727_v52 = vpop.eup %1726  ;;  %v1019_v60 = vadd.f32 1.0, %v1725_v48  ;;  %1732 = vtanh.f32 %v921_v55 }
 0x17f   : > { %v1189_v53 = vadd.f32 %v1188_v45, %v1187_v40  ;;  %v1151_v54 = vmul.f32 %v1071_v46, %v911_v51  ;;  %v639_v56 = vpop.f32.mrf.mxu3  ;;  %v1022_v5 = vadd.f32 1.0, %v1727_v52 }
 0x180   : > { %v1202_v57 = vadd.f32 %v1201_v49, %v1200_v44  ;;  %v640_v58 = vadd.f32 %v639_v56, %v2184_v1  ;;  %v726_v59 = vpop.f32.mrf.mxu2  ;;  %v1099_v50 = vmul.f32 %v1019_v60, %v859_v26 }
 0x181   : > { %v1235_v0 = vadd.f32 %v1234_v23, %v1151_v54  ;;  %v727_v62 = vadd.f32 %v726_v59, %v2187_v13  ;;  %v1190_v3 = vrot.slane %v1189_v53, 1  ;;  %v709_v8 = vpop.f32.mrf.mxu1  ;;  %v1102_v20 = vmul.f32 %v1022_v5, %v862_v32 }
 0x182   : > { %v1729_v2 = vpop.eup %1728  ;;  %v1203_v4 = vrot.slane %v1202_v57, 1  ;;  %v879_v7 = vmul.f32 0.5, %v640_v58  ;;  %v710_v46 = vadd.f32 %v709_v8, %v2150_v47 }
 0x183   : > { %v1731_v9 = vpop.eup %1730  ;;  %v1029_v10 = vadd.f32 1.0, %v1729_v2  ;;  %v882_v11 = vmul.f32 0.5, %v727_v62  ;;  %v1191_v17 = vadd.f32 %v1190_v3, %v1189_v53 }
 0x184   : > { %v1204_v12 = vadd.f32 %v1203_v4, %v1202_v57  ;;  %v1032_v14 = vadd.f32 1.0, %v1731_v9  ;;  %1734 = vtanh.f32 %v879_v7  ;;  %v1733_v24 = vpop.eup %1732  ;;  %v931_v56 = vmul.f32 0.5, %v710_v46 }
 0x185   : > { %v1109_v16 = vmul.f32 %v1029_v10, %v869_v6  ;;  %1736 = vtanh.f32 %v882_v11  ;;  %v1081_v15 = vadd.f32 1.0, %v1733_v24 }
 0x186   : > { %v1319_v18 = vrot.slane %v1204_v12, 7  ;;  %v1112_v22 = vmul.f32 %v1032_v14, %v872_v41 }
 0x187   : > { %v1205_v25 = vadd.f32 %v1109_v16, %v1099_v50  ;;  %v641_v51 = vpop.f32.mrf.mxu3  ;;  %v1161_v33 = vmul.f32 %v1081_v15, %v921_v55 }
 0x188   : > { %v2204_v28 = vsel %vm1327_vm4, %v1191_v17, %v1319_v18  ;;  %v1244_v29 = vadd.f32 %v1112_v22, %v1102_v20  ;;  %v728_v30 = vpop.f32.mrf.mxu2  ;;  %v642_v27 = vadd.f32 %v641_v51, %v2184_v1 }
 0x189   : > { %v729_v26 = vadd.f32 %v728_v30, %v2187_v13  ;;  %v2208_v23 = vadd.f32 %v1235_v0, %v1161_v33  ;;  %v2210_v38 = vpop.f32.mrf.mxu1 }
 0x18a   : > { %v1735_v31 = vpop.eup %1734  ;;  %v889_v35 = vmul.f32 0.5, %v642_v27 }
 0x18b   : > { %v1737_v34 = vpop.eup %1736  ;;  %v1039_v32 = vadd.f32 1.0, %v1735_v31  ;;  %v892_v36 = vmul.f32 0.5, %v729_v26 }
 0x18c   : > { %v1042_v37 = vadd.f32 1.0, %v1737_v34  ;;  %1738 = vtanh.f32 %v889_v35 }
 0x18d   : > { %v1119_v39 = vmul.f32 %v1039_v32, %v879_v7  ;;  %1740 = vtanh.f32 %v892_v36  ;;  %v2221_v7 = vpop.f32.mrf.mxu0 }
 0x18e   : > { %v1122_v6 = vmul.f32 %v1042_v37, %v882_v11 }
 0x18f   : > { %v1206_v40 = vadd.f32 %v1205_v25, %v1119_v39  ;;  %v644_v41 = vpop.f32.mrf.mxu3 }
 0x190   : > { %v1245_v43 = vadd.f32 %v1244_v29, %v1122_v6  ;;  %v645_v44 = vadd.f32 %v644_v41, %v2184_v1  ;;  %v731_v45 = vpop.f32.mrf.mxu2 }
 0x191   : > { %v732_v48 = vadd.f32 %v731_v45, %v2187_v13  ;;  %v2217_v59 = vpop.f32.mrf.mxu1 }
 0x192   : > { %v899_v49 = vmul.f32 0.5, %v645_v44  ;;  %v1739_v52 = vpop.eup %1738 }
 0x193   : > { %v902_v53 = vmul.f32 0.5, %v732_v48  ;;  %v1741_v54 = vpop.eup %1740  ;;  %v1049_v55 = vadd.f32 1.0, %v1739_v52 }
 0x194   : > { %1742 = vtanh.f32 %v899_v49  ;;  %v1052_v57 = vadd.f32 1.0, %v1741_v54  ;;  %v1225_v54 = vrot.slane %v2191_v19, 4 }
 0x195   : > { %1744 = vtanh.f32 %v902_v53  ;;  %v1129_v58 = vmul.f32 %v1049_v55, %v889_v35  ;;  %v789_v33 = vpop.f32.mrf.mxu0 }
 0x196   : > { %v1132_v60 = vmul.f32 %v1052_v57, %v892_v36  ;;  %1746 = vtanh.f32 %v931_v56 }
 0x197   : > { %v646_v0 = vpop.f32.mrf.mxu3  ;;  %v1207_v62 = vadd.f32 %v1206_v40, %v1129_v58 }
 0x198   : > { %v647_v2 = vadd.f32 %v646_v0, %v2184_v1  ;;  %v733_v47 = vpop.f32.mrf.mxu2  ;;  %v1246_v3 = vadd.f32 %v1245_v43, %v1132_v60  ;;  %v1226_v0 = vadd.f32 %v1225_v54, %v2191_v19 }
 0x199   : > { %v734_v4 = vadd.f32 %v733_v47, %v2187_v13  ;;  %v2223_v22 = vpop.f32.mrf.mxu1 }
 0x19a   : > { %v1743_v5 = vpop.eup %1742  ;;  %v909_v8 = vmul.f32 0.5, %v647_v2 }
 0x19b   : > { %v1745_v9 = vpop.eup %1744  ;;  %v1059_v10 = vadd.f32 1.0, %v1743_v5  ;;  %v912_v11 = vmul.f32 0.5, %v734_v4 }
 0x19c   : > { %v1062_v12 = vadd.f32 1.0, %v1745_v9  ;;  %1748 = vtanh.f32 %v909_v8  ;;  %v1747_v16 = vpop.eup %1746 }
 0x19d   : > { %v1139_v14 = vmul.f32 %v1059_v10, %v899_v49  ;;  %1750 = vtanh.f32 %v912_v11  ;;  %v1091_v15 = vadd.f32 1.0, %v1747_v16  ;;  %v2248_v10 = vld [vmem:[%s2487_s4 + $0x8] sm:$0x3] }
 0x19e   : > { %v1142_v50 = vmul.f32 %v1062_v12, %v902_v53 }
 0x19f   : > { %v1208_v17 = vadd.f32 %v1207_v62, %v1139_v14  ;;  %v649_v18 = vpop.f32.mrf.mxu3  ;;  %v1171_v35 = vmul.f32 %v1091_v15, %v931_v56 }
 0x1a0   : > { %v1247_v20 = vadd.f32 %v1246_v3, %v1142_v50  ;;  %v650_v24 = vadd.f32 %v649_v18, %v2184_v1  ;;  %v736_v25 = vpop.f32.mrf.mxu2 }
 0x1a1   : > { %v737_v51 = vadd.f32 %v736_v25, %v2187_v13  ;;  %v1237_v45 = vadd.f32 %v2208_v23, %v1171_v35  ;;  %v2230_v46 = vpop.f32.mrf.mxu1 }
 0x1a2   : > { %v1749_v29 = vpop.eup %1748  ;;  %v919_v30 = vmul.f32 0.5, %v650_v24 }
 0x1a3   : > { %v1751_v27 = vpop.eup %1750  ;;  %v1069_v26 = vadd.f32 1.0, %v1749_v29  ;;  %v922_v31 = vmul.f32 0.5, %v737_v51  ;;  %v1238_v57 = vrot.slane %v1237_v45, 4 }
 0x1a4   : > { %v1072_v34 = vadd.f32 1.0, %v1751_v27  ;;  %1752 = vtanh.f32 %v919_v30 }
 0x1a5   : > { %v1149_v32 = vmul.f32 %v1069_v26, %v909_v8  ;;  %1754 = vtanh.f32 %v922_v31  ;;  %v1239_v4 = vadd.f32 %v1238_v57, %v1237_v45 }
 0x1a6   : > { %v1152_v36 = vmul.f32 %v1072_v34, %v912_v11 }
 0x1a7   : > { %v1209_v37 = vadd.f32 %v1208_v17, %v1149_v32  ;;  %v651_v39 = vpop.f32.mrf.mxu3  ;;  %v1240_v50 = vrot.slane %v1239_v4, 2  ;;  %v2257_v17 = vperm.slane %v2248_v10, 0 }
 0x1a8   : > { %v1248_v6 = vadd.f32 %v1247_v20, %v1152_v36  ;;  %v652_v40 = vadd.f32 %v651_v39, %v2184_v1  ;;  %v738_v41 = vpop.f32.mrf.mxu2  ;;  %v2234_v1 = vperm.slane %v2116_v61, 7  ;;  %v1227_v61 = vrot.slane %v1226_v0, 2 }
 0x1a9   : > { %v739_v43 = vadd.f32 %v738_v41, %v2187_v13  ;;  %v791_v13 = vpop.f32.mrf.mxu0  ;;  %v2250_v19 = vpop.f32.mrf.mxu1  ;;  %v1241_v27 = vadd.f32 %v1240_v50, %v1239_v4  ;;  %v809_v34 = vadd.f32 %v2210_v38, %v2257_v17 }
 0x1aa   : > { %v1753_v44 = vpop.eup %1752  ;;  %v929_v48 = vmul.f32 0.5, %v652_v40  ;;  %v782_v62 = vadd.f32 %v2201_v21, %v2234_v1  ;;  %v780_v21 = vadd.f32 %v2197_v63, %v2234_v1  ;;  %v785_v14 = vadd.f32 %v2212_v42, %v2234_v1 }
 0x1ab   : > { %v1755_v49 = vpop.eup %1754  ;;  %v1079_v52 = vadd.f32 1.0, %v1753_v44  ;;  %v932_v53 = vmul.f32 0.5, %v739_v43  ;;  %v1228_v24 = vadd.f32 %v1227_v61, %v1226_v0  ;;  %v787_v25 = vadd.f32 %v2221_v7, %v2234_v1 }
 0x1ac   : > { %v1082_v55 = vadd.f32 1.0, %v1755_v49  ;;  %1756 = vtanh.f32 %v929_v48  ;;  %v2243_v9 = vmul.f32 0.5, %v782_v62  ;;  %v2266_v15 = vmul.f32 0.5, %v780_v21 }
 0x1ad   : > { %v1159_v56 = vmul.f32 %v1079_v52, %v919_v30  ;;  %1758 = vtanh.f32 %v932_v53  ;;  %v2268_v30 = vmul.f32 0.5, %v785_v14  ;;  %v790_v26 = vadd.f32 %v789_v33, %v2234_v1 }
 0x1ae   : > { %v1162_v58 = vmul.f32 %v1082_v55, %v922_v31  ;;  %1760 = vtanh.f32 %v2243_v9  ;;  %v1229_v35 = vrot.slane %v1228_v24, 1  ;;  %v2273_v36 = vmul.f32 0.5, %v787_v25 }
 0x1af   : > { %v1210_v60 = vadd.f32 %v1209_v37, %v1159_v56  ;;  %v2236_v23 = vpop.f32.mrf.mxu3  ;;  %v792_v7 = vadd.f32 %v791_v13, %v2234_v1  ;;  %1762 = vtanh.f32 %v2266_v15  ;;  %v1242_v40 = vrot.slane %v1241_v27, 1 }
 0x1b0   : > { %v1249_v2 = vadd.f32 %v1248_v6, %v1162_v58  ;;  %v2241_v47 = vpop.f32.mrf.mxu2  ;;  %1764 = vtanh.f32 %v2268_v30  ;;  %v2278_v41 = vmul.f32 0.5, %v790_v26  ;;  %v2282_v38 = vmul.f32 0.5, %v809_v34 }
 0x1b1   : > { %v794_v51 = vpop.f32.mrf.mxu0  ;;  %v2280_v43 = vpop.f32.mrf.mxu1  ;;  %v811_v44 = vadd.f32 %v2217_v59, %v2257_v17  ;;  %v1230_v49 = vadd.f32 %v1229_v35, %v1228_v24  ;;  %1766 = vtanh.f32 %v2273_v36  ;;  %v2289_v52 = vmul.f32 0.5, %v792_v7  ;;  %v1824_v35 = vld [vmem:[%s2487_s4] sm:$0xff] }
 0x1b2   : > { %v1757_v3 = vpop.eup %1756  ;;  %v1243_v57 = vadd.f32 %v1242_v40, %v1241_v27  ;;  %1768 = vtanh.f32 %v2278_v41  ;;  %v814_v13 = vadd.f32 %v2223_v22, %v2257_v17  ;;  %v795_v62 = vadd.f32 %v794_v51, %v2234_v1 }
 0x1b3   : > { %v1759_v5 = vpop.eup %1758  ;;  %v1089_v8 = vadd.f32 1.0, %v1757_v3  ;;  %1770 = vtanh.f32 %v2282_v38  ;;  %v2297_v0 = vmul.f32 0.5, %v811_v44  ;;  %v1321_v4 = vrot.slane %v1230_v49, 5 }
 0x1b4   : > { %v1092_v11 = vadd.f32 1.0, %v1759_v5  ;;  %v1761_v6 = vpop.eup %1760  ;;  %1772 = vtanh.f32 %v2289_v52  ;;  %v1322_v21 = vrot.slane %v1243_v57, 4  ;;  %v816_v51 = vadd.f32 %v2230_v46, %v2257_v17 }
 0x1b5   : > { %v1169_v12 = vmul.f32 %v1089_v8, %v929_v48  ;;  %v1034_v55 = vadd.f32 1.0, %v1761_v6  ;;  %1774 = vtanh.f32 %v2297_v0 }
 0x1b6   : > { %v1172_v16 = vmul.f32 %v1092_v11, %v932_v53  ;;  %v2332_v40 = vmul.f32 0.5, %v816_v51 }
 0x1b7   : > { %v1211_v18 = vadd.f32 %v1210_v60, %v1169_v12  ;;  %v2259_v20 = vpop.f32.mrf.mxu3  ;;  %v1763_v60 = vpop.eup %1762  ;;  %v2302_v12 = vmul.f32 0.5, %v814_v13 }
 0x1b8   : > { %v1250_v63 = vadd.f32 %v1249_v2, %v1172_v16  ;;  %v2264_v29 = vpop.f32.mrf.mxu2  ;;  %v1765_v3 = vpop.eup %1764  ;;  %v1024_v11 = vadd.f32 1.0, %v1763_v60  ;;  %v2305_v16 = vmul.f32 0.5, %v795_v62 }
 0x1b9   : > { %v1212_v42 = vrot.slane %v1211_v18, 4  ;;  %v796_v59 = vpop.f32.mrf.mxu0  ;;  %v1767_v22 = vpop.eup %1766  ;;  %v1044_v50 = vadd.f32 1.0, %v1765_v3  ;;  %1776 = vtanh.f32 %v2302_v12 }
 0x1ba   : > { %v1251_v31 = vrot.slane %v1250_v63, 4  ;;  %v797_v8 = vadd.f32 %v796_v59, %v2234_v1  ;;  %v1769_v25 = vpop.eup %1768  ;;  %v1114_v1 = vmul.f32 %v1034_v55, %v2243_v9  ;;  %v823_v27 = vpop.f32.mrf.mxu1  ;;  %v1054_v34 = vadd.f32 1.0, %v1767_v22 }
 0x1bb   : > { %v1213_v32 = vadd.f32 %v1212_v42, %v1211_v18  ;;  %v2324_v9 = vperm.slane %v1824_v35, 6  ;;  %v1104_v46 = vmul.f32 %v1024_v11, %v2266_v15  ;;  %1778 = vtanh.f32 %v2305_v16 }
 0x1bc   : > { %v1252_v37 = vadd.f32 %v1251_v31, %v1250_v63  ;;  %v1771_v31 = vpop.eup %1770  ;;  %v824_v3 = vadd.f32 %v823_v27, %v2257_v17 }
 0x1bd   : > { %v1214_v39 = vrot.slane %v1213_v32, 2  ;;  %v1773_v7 = vpop.eup %1772  ;;  %v1270_v6 = vadd.f32 %v1114_v1, %v1104_v46  ;;  %v1025_v49 = vadd.f32 1.0, %v1771_v31 }
 0x1be   : > { %v1253_v33 = vrot.slane %v1252_v37, 2  ;;  %v1775_v44 = vpop.eup %1774  ;;  %v1074_v15 = vadd.f32 1.0, %v1773_v7 }
 0x1bf   : > { %v1215_v45 = vadd.f32 %v1214_v39, %v1213_v32  ;;  %v2286_v48 = vpop.f32.mrf.mxu3  ;;  %v2319_v32 = vmul.f32 0.5, %v797_v8  ;;  %v1064_v39 = vadd.f32 1.0, %v1769_v25  ;;  %v1035_v13 = vadd.f32 1.0, %v1775_v44 }
 0x1c0   : > { %v1254_v53 = vadd.f32 %v1253_v33, %v1252_v37  ;;  %v2291_v54 = vpop.f32.mrf.mxu2  ;;  %v1124_v37 = vmul.f32 %v1044_v50, %v2268_v30  ;;  %v2335_v33 = vperm.slane %v2248_v10, 1  ;;  %v753_v10 = vadd.f32 %v2259_v20, %v2324_v9 }
 0x1c1   : > { %v1216_v56 = vrot.slane %v1215_v45, 1  ;;  %1780 = vtanh.f32 %v2319_v32  ;;  %v1154_v62 = vmul.f32 %v1074_v15, %v2289_v52  ;;  %v1105_v20 = vmul.f32 %v1025_v49, %v2282_v38 }
 0x1c2   : > { %v1255_v58 = vrot.slane %v1254_v53, 1  ;;  %v1271_v55 = vadd.f32 %v1270_v6, %v1124_v37  ;;  %1782 = vtanh.f32 %v2332_v40  ;;  %v756_v52 = vadd.f32 %v2286_v48, %v2324_v9 }
 0x1c3   : > { %v1217_v2 = vadd.f32 %v1216_v56, %v1215_v45  ;;  %v1134_v45 = vmul.f32 %v1054_v34, %v2273_v36  ;;  %v1144_v56 = vmul.f32 %v1064_v39, %v2278_v41  ;;  %v1777_v36 = vpop.eup %1776  ;;  %v840_v41 = vadd.f32 %v2264_v29, %v2335_v33 }
 0x1c4   : > { %v1256_v5 = vadd.f32 %v1255_v58, %v1254_v53  ;;  %v821_v53 = vadd.f32 %v2280_v43, %v2257_v17  ;;  %v1779_v58 = vpop.eup %1778  ;;  %v1045_v8 = vadd.f32 1.0, %v1777_v36  ;;  %v1115_v22 = vmul.f32 %v1035_v13, %v2297_v0 }
 0x1c5   : > { %v1320_v61 = vrot.slane %v1217_v2, 6  ;;  %v1272_v60 = vadd.f32 %v1271_v55, %v1134_v45  ;;  %v1084_v29 = vadd.f32 1.0, %v1779_v58  ;;  %v843_v38 = vadd.f32 %v2291_v54, %v2335_v33 }
 0x1c6   : > { %v1323_v14 = vrot.slane %v1256_v5, 3  ;;  %v2358_v2 = vmul.f32 0.5, %v821_v53  ;;  %v2375_v48 = vmul.f32 0.5, %v824_v3  ;;  %v1125_v1 = vmul.f32 %v1045_v8, %v2302_v12 }
 0x1c7   : > { %v1330_v18 = vsel %vm1329_vm5, %v1320_v61, %v1321_v4  ;;  %v2307_v24 = vpop.f32.mrf.mxu3  ;;  %v825_v4 = vpop.f32.mrf.mxu1  ;;  %v1273_v5 = vadd.f32 %v1272_v60, %v1144_v56  ;;  %v2361_v61 = vmul.f32 0.5, %v753_v10  ;;  %v2381_v54 = vmul.f32 0.5, %v756_v52 }
 0x1c8   : > { %v2313_v63 = vsel %vm1331_vm6, %v2204_v28, %v1330_v18  ;;  %v2315_v42 = vsel %vm1333_vm7, %v1322_v21, %v1323_v14  ;;  %v2317_v26 = vpop.f32.mrf.mxu2  ;;  %v819_v28 = vadd.f32 %v2250_v19, %v2257_v17  ;;  %v751_v19 = vadd.f32 %v2236_v23, %v2324_v9 }
 0x1c9   : > { %v838_v23 = vadd.f32 %v2241_v47, %v2335_v33  ;;  %v1781_v47 = vpop.eup %1780  ;;  %v1274_v21 = vadd.f32 %v1273_v5, %v1154_v62  ;;  %v2371_v14 = vmul.f32 0.5, %v840_v41  ;;  %v826_v50 = vadd.f32 %v825_v4, %v2257_v17 }
 0x1ca   : > { %v2341_v30 = vmul.f32 0.5, %v819_v28  ;;  %v2352_v43 = vmul.f32 0.5, %v751_v19  ;;  %v1783_v18 = vpop.eup %1782  ;;  %v1094_v25 = vadd.f32 1.0, %v1781_v47  ;;  %v758_v0 = vadd.f32 %v2307_v24, %v2324_v9 }
 0x1cb   : > { %v2366_v11 = vmul.f32 0.5, %v838_v23  ;;  %v845_v51 = vadd.f32 %v2317_v26, %v2335_v33  ;;  %v1164_v31 = vmul.f32 %v1084_v29, %v2305_v16  ;;  %v2387_v34 = vmul.f32 0.5, %v843_v38 }
 0x1cc   : > { %1784 = vtanh.f32 %v2341_v30  ;;  %v1055_v7 = vadd.f32 1.0, %v1783_v18  ;;  %v2391_v12 = vmul.f32 0.5, %v826_v50  ;;  %v1174_v26 = vmul.f32 %v1094_v25, %v2319_v32 }
 0x1cd   : > { %1786 = vtanh.f32 %v2352_v43  ;;  %v2396_v16 = vmul.f32 0.5, %v758_v0  ;;  %v2400_v6 = vmul.f32 0.5, %v845_v51  ;;  %v1283_v15 = vadd.f32 %v1115_v22, %v1105_v20 }
 0x1ce   : > { %1788 = vtanh.f32 %v2358_v2  ;;  %v1275_v49 = vadd.f32 %v1274_v21, %v1164_v31  ;;  %v1135_v10 = vmul.f32 %v1055_v7, %v2332_v40  ;;  %v281_v4 = vlaneseq }
 0x1cf   : > { %v760_v57 = vpop.f32.mrf.mxu3  ;;  %1790 = vtanh.f32 %v2361_v61  ;;  %v1284_v56 = vadd.f32 %v1283_v15, %v1125_v1  ;;  %v1850_v1 = vmov 0.0  }
 0x1d0   : > { %v847_v59 = vpop.f32.mrf.mxu2  ;;  %1792 = vtanh.f32 %v2366_v11  ;;  %v761_v35 = vadd.f32 %v760_v57, %v2324_v9  ;;  %v2414_v13 = vadd.f32 %v1275_v49, %v1174_v26  ;;  %vm2435_vm8 = vcmp.lt.s32.totalorder %v281_v4, 256 }
 0x1d1   : > { %1794 = vtanh.f32 %v2371_v14  ;;  %v848_v46 = vadd.f32 %v847_v59, %v2335_v33  ;;  %v1285_v18 = vadd.f32 %v1284_v56, %v1135_v10  ;;  %285 = vst.msk [vmem:[%s2425_s11 + $0x8] sm:$0x3] %vm2435_vm8, %v1850_v1 }
 0x1d2   : > { %v1785_v17 = vpop.eup %1784  ;;  %1796 = vtanh.f32 %v2375_v48  ;;  %v2404_v19 = vmul.f32 0.5, %v761_v35  ;;  %v1277_v35 = vrot.slane %v2414_v13, 4 }
 0x1d3   : > { %v1787_v37 = vpop.eup %1786  ;;  %v1065_v39 = vadd.f32 1.0, %v1785_v17  ;;  %1798 = vtanh.f32 %v2381_v54  ;;  %v2408_v53 = vmul.f32 0.5, %v848_v46 }
 0x1d4   : > { %v1789_v45 = vpop.eup %1788  ;;  %1800 = vtanh.f32 %v2387_v34  ;;  %v1023_v5 = vadd.f32 1.0, %v1787_v37 }
 0x1d5   : > { %v1791_v32 = vpop.eup %1790  ;;  %1802 = vtanh.f32 %v2391_v12  ;;  %v1145_v23 = vmul.f32 %v1065_v39, %v2341_v30  ;;  %v1075_v62 = vadd.f32 1.0, %v1789_v45 }
 0x1d6   : > { %v1793_v55 = vpop.eup %1792  ;;  %1804 = vtanh.f32 %v2396_v16  ;;  %v1033_v41 = vadd.f32 1.0, %v1791_v32  ;;  %v1103_v26 = vmul.f32 %v1023_v5, %v2352_v43 }
 0x1d7   : > { %v762_v27 = vpop.f32.mrf.mxu3  ;;  %v1795_v36 = vpop.eup %1794  ;;  %1806 = vtanh.f32 %v2400_v6  ;;  %v1026_v8 = vadd.f32 1.0, %v1793_v55  ;;  %v1155_v25 = vmul.f32 %v1075_v62, %v2358_v2 }
 0x1d8   : > { %v849_v24 = vpop.f32.mrf.mxu2  ;;  %v763_v28 = vadd.f32 %v762_v27, %v2324_v9  ;;  %v1797_v60 = vpop.eup %1796  ;;  %1808 = vtanh.f32 %v2404_v19  ;;  %v1036_v29 = vadd.f32 1.0, %v1795_v36  ;;  %v1113_v27 = vmul.f32 %v1033_v41, %v2361_v61 }
 0x1d9   : > { %v850_v44 = vadd.f32 %v849_v24, %v2335_v33  ;;  %v1799_v3 = vpop.eup %1798  ;;  %1810 = vtanh.f32 %v2408_v53  ;;  %v1085_v0 = vadd.f32 1.0, %v1797_v60  ;;  %v1286_v24 = vadd.f32 %v1285_v18, %v1145_v23 }
 0x1da   : > { %v2412_v57 = vmul.f32 0.5, %v763_v28  ;;  %v1801_v47 = vpop.eup %1800  ;;  %v1043_v17 = vadd.f32 1.0, %v1799_v3  ;;  %v1106_v28 = vmul.f32 %v1026_v8, %v2366_v11  ;;  %v1116_v37 = vmul.f32 %v1036_v29, %v2371_v14 }
 0x1db   : > { %v2418_v59 = vmul.f32 0.5, %v850_v44  ;;  %v1803_v22 = vpop.eup %1802  ;;  %v1046_v7 = vadd.f32 1.0, %v1801_v47  ;;  %v1287_v61 = vadd.f32 %v1286_v24, %v1155_v25  ;;  %v1165_v15 = vmul.f32 %v1085_v0, %v2375_v48 }
 0x1dc   : > { %1812 = vtanh.f32 %v2412_v57  ;;  %v1805_v50 = vpop.eup %1804  ;;  %v1095_v46 = vadd.f32 1.0, %v1803_v22  ;;  %v1257_v10 = vadd.f32 %v1113_v27, %v1103_v26  ;;  %v1123_v36 = vmul.f32 %v1043_v17, %v2381_v54 }
 0x1dd   : > { %1814 = vtanh.f32 %v2418_v59  ;;  %v1807_v51 = vpop.eup %1806  ;;  %v1053_v39 = vadd.f32 1.0, %v1805_v50  ;;  %v1126_v14 = vmul.f32 %v1046_v7, %v2387_v34  ;;  %v1296_v48 = vadd.f32 %v1116_v37, %v1106_v28 }
 0x1de   : > { %v1809_v31 = vpop.eup %1808  ;;  %v1056_v32 = vadd.f32 1.0, %v1807_v51  ;;  %v1288_v3 = vadd.f32 %v1287_v61, %v1165_v15  ;;  %v1258_v4 = vadd.f32 %v1257_v10, %v1123_v36 }
 0x1df   : > { %v765_v58 = vpop.f32.mrf.mxu3  ;;  %v1811_v2 = vpop.eup %1810  ;;  %v1063_v23 = vadd.f32 1.0, %v1809_v31  ;;  %v1297_v34 = vadd.f32 %v1296_v48, %v1126_v14 }
 0x1e0   : > { %v766_v40 = vadd.f32 %v765_v58, %v2324_v9  ;;  %v852_v20 = vpop.f32.mrf.mxu2  ;;  %v1175_v58 = vmul.f32 %v1095_v46, %v2391_v12  ;;  %v1066_v60 = vadd.f32 1.0, %v1811_v2 }
 0x1e1   : > { %v853_v30 = vadd.f32 %v852_v20, %v2335_v33 }
 0x1e2   : > { %v2430_v52 = vmul.f32 0.5, %v766_v40  ;;  %v1813_v45 = vpop.eup %1812  ;;  %v1133_v40 = vmul.f32 %v1053_v39, %v2396_v16  ;;  %v1289_v12 = vadd.f32 %v1288_v3, %v1175_v58  ;;  %v1146_v5 = vmul.f32 %v1066_v60, %v2408_v53 }
 0x1e3   : > { %v2433_v38 = vmul.f32 0.5, %v853_v30  ;;  %v1815_v56 = vpop.eup %1814  ;;  %v1136_v30 = vmul.f32 %v1056_v32, %v2400_v6  ;;  %v1278_v6 = vadd.f32 %v1277_v35, %v2414_v13 }
 0x1e4   : > { %1816 = vtanh.f32 %v2430_v52  ;;  %v1076_v54 = vadd.f32 1.0, %v1815_v56  ;;  %v1259_v22 = vadd.f32 %v1258_v4, %v1133_v40 }
 0x1e5   : > { %1818 = vtanh.f32 %v2433_v38  ;;  %v1298_v29 = vadd.f32 %v1297_v34, %v1136_v30  ;;  %v1279_v7 = vrot.slane %v1278_v6, 2 }
 0x1e6   : > { %v1156_v50 = vmul.f32 %v1076_v54, %v2418_v59 }
 0x1e7   : > { %v767_v44 = vpop.f32.mrf.mxu3  ;;  %v1299_v1 = vadd.f32 %v1298_v29, %v1146_v5  ;;  %v1280_v28 = vadd.f32 %v1279_v7, %v1278_v6 }
 0x1e8   : > { %v768_v49 = vadd.f32 %v767_v44, %v2324_v9  ;;  %v854_v55 = vpop.f32.mrf.mxu2  ;;  %v1073_v9 = vadd.f32 1.0, %v1813_v45 }
 0x1e9   : > { %v855_v43 = vadd.f32 %v854_v55, %v2335_v33  ;;  %v1143_v33 = vmul.f32 %v1063_v23, %v2404_v19  ;;  %v1290_v19 = vrot.slane %v1289_v12, 4  ;;  %v1300_v31 = vadd.f32 %v1299_v1, %v1156_v50 }
 0x1ea   : > { %v1817_v11 = vpop.eup %1816  ;;  %v933_v62 = vmul.f32 0.5, %v768_v49  ;;  %v1153_v16 = vmul.f32 %v1073_v9, %v2412_v57 }
 0x1eb   : > { %v1819_v41 = vpop.eup %1818  ;;  %v936_v20 = vmul.f32 0.5, %v855_v43  ;;  %v1083_v47 = vadd.f32 1.0, %v1817_v11  ;;  %v1260_v18 = vadd.f32 %v1259_v22, %v1143_v33  ;;  %v1291_v2 = vadd.f32 %v1290_v19, %v1289_v12 }
 0x1ec   : > { %1820 = vtanh.f32 %v933_v62  ;;  %v1086_v8 = vadd.f32 1.0, %v1819_v41 }
 0x1ed   : > { %1822 = vtanh.f32 %v936_v20  ;;  %v1163_v25 = vmul.f32 %v1083_v47, %v2430_v52  ;;  %v1261_v17 = vadd.f32 %v1260_v18, %v1153_v16  ;;  %v1292_v37 = vrot.slane %v1291_v2, 2 }
 0x1ee   : > { %v1166_v51 = vmul.f32 %v1086_v8, %v2433_v38  ;;  %v1281_v38 = vrot.slane %v1280_v28, 1 }
 0x1ef   : > { %v1262_v57 = vadd.f32 %v1261_v17, %v1163_v25  ;;  %v1293_v15 = vadd.f32 %v1292_v37, %v1291_v2 }
 0x1f0   : > { %v1301_v59 = vadd.f32 %v1300_v31, %v1166_v51  ;;  %v1282_v56 = vadd.f32 %v1281_v38, %v1280_v28 }
 0x1f1   : > { %v1294_v36 = vrot.slane %v1293_v15, 1 }
 0x1f2   : > { %v1821_v0 = vpop.eup %1820  ;;  %v1325_v14 = vrot.slane %v1282_v56, 1 }
 0x1f3   : > { %v1823_v27 = vpop.eup %1822  ;;  %v1093_v53 = vadd.f32 1.0, %v1821_v0  ;;  %v1295_v60 = vadd.f32 %v1294_v36, %v1293_v15 }
 0x1f4   : > { %v1096_v24 = vadd.f32 1.0, %v1823_v27 }
 0x1f5   : > { %v1173_v46 = vmul.f32 %v1093_v53, %v933_v62  ;;  %v1178_v62 = vld [vmem:[%s2425_s11 + $0x8] sm:$0x3] }
 0x1f6   : > { %v1176_v26 = vmul.f32 %v1096_v24, %v936_v20 }
 0x1f7   : > { %v1263_v13 = vadd.f32 %v1262_v57, %v1173_v46 }
 0x1f8   : > { %v1302_v35 = vadd.f32 %v1301_v59, %v1176_v26 }
 0x1f9   : > { %v1264_v52 = vrot.slane %v1263_v13, 4 }
 0x1fa   : > { %v1303_v39 = vrot.slane %v1302_v35, 4 }
 0x1fb   : > { %v1265_v44 = vadd.f32 %v1264_v52, %v1263_v13 }
 0x1fc   : > { %v1304_v45 = vadd.f32 %v1303_v39, %v1302_v35 }
 0x1fd   : > { %v1266_v61 = vrot.slane %v1265_v44, 2 }
 0x1fe   : > { %v1305_v32 = vrot.slane %v1304_v45, 2 }
 0x1ff   : > { %v1267_v49 = vadd.f32 %v1266_v61, %v1265_v44 }
 0x200   : > { %v1306_v55 = vadd.f32 %v1305_v32, %v1304_v45 }
 0x201   : > { %v1268_v10 = vrot.slane %v1267_v49, 1 }
 0x202   : > { %v1307_v23 = vrot.slane %v1306_v55, 1 }
 0x203   : > { %v1269_v43 = vadd.f32 %v1268_v10, %v1267_v49 }
 0x204   : > { %v1308_v11 = vadd.f32 %v1307_v23, %v1306_v55 }
 0x205   : > { %v1324_v58 = vrot.slane %v1269_v43, 2 }
 0x206   : > { %v1326_v41 = vrot.slane %v1308_v11, 7 }
 0x207   : > { %v1336_v48 = vsel %vm1335_vm9, %v1324_v58, %v1325_v14 }
 0x208   : > { %v1338_v40 = vsel %vm1337_vm10, %v2315_v42, %v1336_v48  ;;  %v1340_v9 = vsel %vm1327_vm4, %v1295_v60, %v1326_v41 }
 0x209   : > { %v1339_v20 = vsel %vm338_vm0, %v2313_v63, %v1338_v40  ;;  %v1344_v3 = vadd.f32 %v1340_v9, %v1178_v62 }
 0x20a   : > { %1345 = vst [vmem:[%s2425_s11] sm:$0xff] %v1339_v20 }
 0x20b   : > { %1350 = vst.msk [vmem:[%s2425_s11 + $0x8] sm:$0x3] %vm2435_vm8, %v1344_v3 }
 0x20c PF: > { %s15_s20 = sadd.s32 1, %s1847_s20   ;;  %s2491_s18 = smov %s1843_s19 }
 0x20d   : > { %p12_p5 = scmp.ge.s32.totalorder %s15_s20, 4   ;;  %s2492_s19 = smov %s2494_s21 }
 0x20f   :  { %14 = sbr.rel (!%p12_p5) target bundleno = 2 (0x2), region = 74 }

// kernel: multimodal_efficientnet_forward.3
= control target key start
LH: loop header
LB: loop body
LE: loop exit
PB: predicated region body
PF: predicated region fallthrough
CT: control target
= control target key end

     0   :  { %16 = vsyncpa [#allocation3], 0  ;;  %s1677_s0 = inlined_call_operand.vmem [shape: bf16[2,1280], index: 0, kind: input, shape index: {}]   ;;  %s1678_s1 = inlined_call_operand.vmem [shape: f32[2,3], index: 1, kind: input, shape index: {}]   ;;  %s1679_s2 = inlined_call_operand.vmem [shape: f32[3,64], index: 2, kind: input, shape index: {}]   ;;  %s1680_s3 = inlined_call_operand.vmem [shape: f32[1,64], index: 3, kind: input, shape index: {}]   ;;  %s1681_s4 = inlined_call_operand.vmem [shape: f32[64,64], index: 4, kind: input, shape index: {}]   ;;  %s1682_s5 = inlined_call_operand.vmem [shape: f32[1,64], index: 5, kind: input, shape index: {}]   ;;  %s1683_s6 = inlined_call_operand.hbm [shape: bf16[1280,128], index: 6, kind: input, shape index: {}]   ;;  %s1684_s7 = inlined_call_operand.vmem [shape: f32[64,128], index: 7, kind: input, shape index: {}]   ;;  %s1685_s8 = inlined_call_operand.vmem [shape: f32[1,128], index: 8, kind: input, shape index: {}]   ;;  %s1686_s9 = inlined_call_operand.vmem [shape: f32[128,128], index: 9, kind: input, shape index: {}]   ;;  %s1687_s10 = inlined_call_operand.vmem [shape: f32[1,128], index: 10, kind: input, shape index: {}]   ;;  %s1688_s11 = inlined_call_operand.hbm [shape: f32[2,128], index: 11, kind: output, shape index: {}]  }
   0x1   :  { %17 = vsyncpa [#allocation4], 0  ;;  %s34_s19 = sshll.u32 %s1683_s6, 4  ;;  %s1482_s20 = smov [#allocation2]   ;;  %s35_s19 = int_to_ptr.hbm [resolvable:$true] %s34_s19 }
   0x2   :  { %s36_s21 = sshll.u32 %s1482_s20, 4  ;;  %s1483_s22 = smov 64   ;;  %s37_s21 = int_to_ptr.vmem [resolvable:$true] %s36_s21 }
   0x3   :  { %s1484_s23 = smov 4  }
   0x4   :  { %42 = dma.hbm_to_vmem [thread:$0]  %s35_s19, 10240, %s37_s21, [#allocation3], %s1483_s22, %s1483_s22, %s1484_s23  }
   0x5   :  { %1478 = dma.done.wait [#allocation3], 10240  }
   0x6   :  { %1479 = vsyncadd [#allocation3], 4294957056  ;;  %vm65_vm0 = vcmask 1042432   ;;  %vm61_vm1 = vcmask 23552   ;;  %v56_v0 = vld [vmem:[%s1679_s2] sm:$0x7] }
   0x7   :  { %v55_v1 = vld [vmem:[%s1678_s1] sm:$0x3]  ;;  %v97_v2 = vld [vmem:[%s1681_s4 + $0x38] sm:$0xff]  ;;  %1018 = vmatpush.msk.msra.mxu1 %vm65_vm0, %v56_v0  ;;  %v96_v3 = vld [vmem:[%s1681_s4 + $0x30] sm:$0xff]  ;;  %vm102_vm2 = vcmask 523264   ;;  %s1485_s27 = smov [#allocation5]  }
   0x8   :  { %114 = vmatpush.msra.mxu2 %v97_v2  ;;  %1019 = vmatmul.msk.f32.vlgmr.msra.gmra.mxu1 %vm61_vm1, %v55_v1  ;;  %v95_v4 = vld [vmem:[%s1681_s4 + $0x28] sm:$0xff]  ;;  %v94_v5 = vld [vmem:[%s1681_s4 + $0x20] sm:$0xff]  ;;  %v93_v6 = vld [vmem:[%s1681_s4 + $0x18] sm:$0xff]  ;;  %s1008_s29 = sshll.u32 %s1688_s11, 4  ;;  %s1009_s29 = int_to_ptr.hbm [resolvable:$true] %s1008_s29 }
   0x9   :  { %v92_v7 = vld [vmem:[%s1681_s4 + $0x10] sm:$0xff]  ;;  %v91_v8 = vld [vmem:[%s1681_s4 + $0x8] sm:$0xff]  ;;  %v90_v9 = vld [vmem:[%s1681_s4] sm:$0xff]  ;;  %s1006_s4 = sshll.u32 %s1485_s27, 4  ;;  %s1007_s4 = int_to_ptr.vmem [resolvable:$true] %s1006_s4 }
   0xa   :  { %115 = vmatpush.msra.mxu2 %v96_v3  ;;  %v1349_v10 = vld [vmem:[#allocation2 + $0x38] sm:$0xff]  ;;  %v1348_v12 = vld [vmem:[#allocation2 + $0x30] sm:$0xff]  ;;  %v295_v15 = vld [vmem:[%s1684_s7 + $0x30] sm:$0xff] }
   0xb   :  { %v1357_v11 = vld [vmem:[#allocation2 + $0x78] sm:$0xff]  ;;  %824 = vmatpush.bf16.msra.mxu3 %v1349_v10  ;;  %v296_v13 = vld [vmem:[%s1684_s7 + $0x38] sm:$0xff]  ;;  %v294_v16 = vld [vmem:[%s1684_s7 + $0x28] sm:$0xff] }
   0xc   :  { %116 = vmatpush.msra.mxu2 %v95_v4  ;;  %837 = vmatpush.bf16.msra.mxu0 %v1357_v11  ;;  %v1356_v14 = vld [vmem:[#allocation2 + $0x70] sm:$0xff]  ;;  %v1365_v17 = vld [vmem:[#allocation2 + $0xb8] sm:$0xff]  ;;  %v1347_v18 = vld [vmem:[#allocation2 + $0x28] sm:$0xff] }
   0xd   :  { %v293_v19 = vld [vmem:[%s1684_s7 + $0x20] sm:$0xff]  ;;  %v1355_v20 = vld [vmem:[#allocation2 + $0x68] sm:$0xff]  ;;  %850 = vmatpush.bf16.msrb.mxu1 %v1365_v17  ;;  %v292_v21 = vld [vmem:[%s1684_s7 + $0x18] sm:$0xff] }
   0xe   :  { %117 = vmatpush.msra.mxu2 %v94_v5  ;;  %v1364_v22 = vld [vmem:[#allocation2 + $0xb0] sm:$0xff]  ;;  %v1346_v23 = vld [vmem:[#allocation2 + $0x20] sm:$0xff]  ;;  %v291_v24 = vld [vmem:[%s1684_s7 + $0x10] sm:$0xff] }
   0xf   :  { %825 = vmatpush.bf16.msra.mxu3 %v1348_v12  ;;  %v1354_v25 = vld [vmem:[#allocation2 + $0x60] sm:$0xff]  ;;  %v1363_v27 = vld [vmem:[#allocation2 + $0xa8] sm:$0xff]  ;;  %v1345_v28 = vld [vmem:[#allocation2 + $0x18] sm:$0xff] }
  0x10   :  { %118 = vmatpush.msra.mxu2 %v93_v6  ;;  %838 = vmatpush.bf16.msra.mxu0 %v1356_v14  ;;  %v290_v26 = vld [vmem:[%s1684_s7 + $0x8] sm:$0xff]  ;;  %v289_v29 = vld [vmem:[%s1684_s7] sm:$0xff]  ;;  %v1344_v32 = vld [vmem:[#allocation2 + $0x10] sm:$0xff] }
  0x11   :  { %851 = vmatpush.bf16.msrb.mxu1 %v1364_v22  ;;  %v1353_v30 = vld [vmem:[#allocation2 + $0x58] sm:$0xff]  ;;  %v1362_v31 = vld [vmem:[#allocation2 + $0xa0] sm:$0xff]  ;;  %v1352_v33 = vld [vmem:[#allocation2 + $0x50] sm:$0xff] }
  0x12   :  { %119 = vmatpush.msra.mxu2 %v92_v7  ;;  %v1361_v34 = vld [vmem:[#allocation2 + $0x98] sm:$0xff]  ;;  %v1343_v35 = vld [vmem:[#allocation2 + $0x8] sm:$0xff]  ;;  %v1360_v38 = vld [vmem:[#allocation2 + $0x90] sm:$0xff] }
  0x13   :  { %826 = vmatpush.bf16.msra.mxu3 %v1347_v18  ;;  %v1351_v36 = vld [vmem:[#allocation2 + $0x48] sm:$0xff]  ;;  %v1426_v37 = vld [vmem:[%s1680_s3] ss:$0 sm:$0xff]  ;;  %v1342_v40 = vld [vmem:[#allocation2] sm:$0xff] }
  0x14   :  { %120 = vmatpush.msra.mxu2 %v91_v8  ;;  %839 = vmatpush.bf16.msra.mxu0 %v1355_v20  ;;  %v127_v39 = vld [vmem:[%s1677_s0] sm:$0xff]  ;;  %v1350_v43 = vld [vmem:[#allocation2 + $0x40] sm:$0xff]  ;;  %v1359_v47 = vld [vmem:[#allocation2 + $0x88] sm:$0xff] }
  0x15   :  { %852 = vmatpush.bf16.msrb.mxu1 %v1363_v27  ;;  %321 = vst [vmem:[#allocation1] ss:$9 sm:$0xff] %v127_v39  ;;  %v1381_v42 = vld [vmem:[#allocation2 + $0x138] sm:$0xff]  ;;  %v1380_v49 = vld [vmem:[#allocation2 + $0x130] sm:$0xff]  ;;  %v1358_v53 = vld [vmem:[#allocation2 + $0x80] sm:$0xff] }
  0x16   :  { %121 = vmatpush.msra.mxu2 %v90_v9  ;;  %v1389_v45 = vld [vmem:[#allocation2 + $0x178] sm:$0xff]  ;;  %v1388_v50 = vld [vmem:[#allocation2 + $0x170] sm:$0xff]  ;;  %v1379_v55 = vld [vmem:[#allocation2 + $0x128] sm:$0xff] }
  0x17   :  { %827 = vmatpush.bf16.msra.mxu3 %v1346_v23  ;;  %v1373_v46 = vld [vmem:[#allocation2 + $0xf8] sm:$0xff]  ;;  %v1372_v52 = vld [vmem:[#allocation2 + $0xf0] sm:$0xff]  ;;  %v1387_v56 = vld [vmem:[#allocation2 + $0x168] sm:$0xff] }
  0x18   :  { %308 = vmatpush.msrb.mxu2 %v296_v13  ;;  %840 = vmatpush.bf16.msra.mxu0 %v1354_v25  ;;  %v1397_v54 = vld [vmem:[#allocation2 + $0x1b8] sm:$0xff]  ;;  %v1371_v57 = vld [vmem:[#allocation2 + $0xe8] sm:$0xff]  ;;  %v1396_v58 = vld [vmem:[#allocation2 + $0x1b0] sm:$0xff] }
  0x19   :  { %853 = vmatpush.bf16.msrb.mxu1 %v1362_v31  ;;  %v1378_v59 = vld [vmem:[#allocation2 + $0x120] sm:$0xff]  ;;  %v1377_v62 = vld [vmem:[#allocation2 + $0x118] sm:$0xff]  ;;  %v1376_v1 = vld [vmem:[#allocation2 + $0x110] sm:$0xff] }
  0x1a   :  { %309 = vmatpush.msrb.mxu2 %v295_v15  ;;  %v1386_v60 = vld [vmem:[#allocation2 + $0x160] sm:$0xff]  ;;  %v1385_v63 = vld [vmem:[#allocation2 + $0x158] sm:$0xff]  ;;  %v1384_v2 = vld [vmem:[#allocation2 + $0x150] sm:$0xff] }
  0x1b   :  { %828 = vmatpush.bf16.msra.mxu3 %v1345_v28  ;;  %v1370_v61 = vld [vmem:[#allocation2 + $0xe0] sm:$0xff]  ;;  %v1369_v0 = vld [vmem:[#allocation2 + $0xd8] sm:$0xff]  ;;  %v1368_v3 = vld [vmem:[#allocation2 + $0xd0] sm:$0xff] }
  0x1c   :  { %310 = vmatpush.msrb.mxu2 %v294_v16  ;;  %841 = vmatpush.bf16.msra.mxu0 %v1353_v30  ;;  %v322_v51 = vld [vmem:[#allocation1] sm:$0xff]  ;;  %v1375_v4 = vld [vmem:[#allocation2 + $0x108] sm:$0xff]  ;;  %v1374_v5 = vld [vmem:[#allocation2 + $0x100] sm:$0xff] }
  0x1d   :  { %854 = vmatpush.bf16.msrb.mxu1 %v1361_v34  ;;  %v1413_v6 = vld [vmem:[#allocation2 + $0x238] sm:$0xff]  ;;  %v1367_v7 = vld [vmem:[#allocation2 + $0xc8] sm:$0xff]  ;;  %v1412_v10 = vld [vmem:[#allocation2 + $0x230] sm:$0xff] }
  0x1e   :  { %311 = vmatpush.msrb.mxu2 %v293_v19  ;;  %v1383_v8 = vld [vmem:[#allocation2 + $0x148] sm:$0xff]  ;;  %v1366_v11 = vld [vmem:[#allocation2 + $0xc0] sm:$0xff]  ;;  %v1421_v16 = vld [vmem:[#allocation2 + $0x278] sm:$0xff] }
  0x1f   :  { %829 = vmatpush.bf16.msra.mxu3 %v1344_v32  ;;  %v1395_v9 = vld [vmem:[#allocation2 + $0x1a8] sm:$0xff]  ;;  %v1382_v12 = vld [vmem:[#allocation2 + $0x140] sm:$0xff]  ;;  %v1393_v18 = vld [vmem:[#allocation2 + $0x198] sm:$0xff] }
  0x20   :  { %312 = vmatpush.msrb.mxu2 %v292_v21  ;;  %842 = vmatpush.bf16.msra.mxu0 %v1352_v33  ;;  %v1394_v13 = vld [vmem:[#allocation2 + $0x1a0] sm:$0xff]  ;;  %v1411_v15 = vld [vmem:[#allocation2 + $0x228] sm:$0xff]  ;;  %v1420_v20 = vld [vmem:[#allocation2 + $0x270] sm:$0xff] }
  0x21   :  { %855 = vmatpush.bf16.msrb.mxu1 %v1360_v38  ;;  %v323_v14 = vld [vmem:[#allocation1 + $0x9] sm:$0xff]  ;;  %v324_v17 = vld [vmem:[#allocation1 + $0x12] sm:$0xff]  ;;  %v1409_v23 = vld [vmem:[#allocation2 + $0x218] sm:$0xff] }
  0x22   :  { %313 = vmatpush.msrb.mxu2 %v291_v24  ;;  %v1410_v19 = vld [vmem:[#allocation2 + $0x220] sm:$0xff]  ;;  %v1392_v21 = vld [vmem:[#allocation2 + $0x190] sm:$0xff]  ;;  %v1419_v24 = vld [vmem:[#allocation2 + $0x268] sm:$0xff] }
  0x23   :  { %830 = vmatpush.bf16.msra.mxu3 %v1343_v35  ;;  %v326_v22 = vld [vmem:[#allocation1 + $0x24] sm:$0xff]  ;;  %v1391_v25 = vld [vmem:[#allocation2 + $0x188] sm:$0xff]  ;;  %v325_v28 = vld [vmem:[#allocation1 + $0x1b] sm:$0xff] }
  0x24   :  { %314 = vmatpush.msrb.mxu2 %v290_v26  ;;  %843 = vmatpush.bf16.msra.mxu0 %v1351_v36  ;;  %v1408_v26 = vld [vmem:[#allocation2 + $0x210] sm:$0xff]  ;;  %v1418_v27 = vld [vmem:[#allocation2 + $0x260] sm:$0xff]  ;;  %v1407_v31 = vld [vmem:[#allocation2 + $0x208] sm:$0xff] }
  0x25   :  { %856 = vmatpush.bf16.msrb.mxu1 %v1359_v47  ;;  %v327_v30 = vld [vmem:[#allocation1 + $0x2d] sm:$0xff]  ;;  %v1417_v32 = vld [vmem:[#allocation2 + $0x258] sm:$0xff]  ;;  %v128_v33 = vld [vmem:[%s1677_s0 + $0x8] sm:$0x3] }
  0x26   :  { %315 = vmatpush.msrb.mxu2 %v289_v29  ;;  %v1390_v29 = vld [vmem:[#allocation2 + $0x180] sm:$0xff]  ;;  %v328_v34 = vld [vmem:[#allocation1 + $0x36] sm:$0xff]  ;;  %v329_v35 = vld [vmem:[#allocation1 + $0x3f] sm:$0xff] }
  0x27   :  { %831 = vmatpush.bf16.msra.mxu3 %v1342_v40  ;;  %331 = vst [vmem:[#allocation1] ss:$9 sm:$0xff] %v128_v33  ;;  %v1406_v36 = vld [vmem:[#allocation2 + $0x200] sm:$0xff]  ;;  %v1427_v38 = vld [vmem:[%s1682_s5] ss:$0 sm:$0xff]  ;;  %v1415_v39 = vld [vmem:[#allocation2 + $0x248] sm:$0xff] }
  0x28   :  { %844 = vmatpush.bf16.msra.mxu0 %v1350_v43  ;;  %v1405_v43 = vld [vmem:[#allocation2 + $0x1f8] sm:$0xff] }
  0x29   :  { %857 = vmatpush.bf16.msrb.mxu1 %v1358_v53  ;;  %v1400_v53 = vld [vmem:[#allocation2 + $0x1d0] sm:$0xff] }
  0x2a   :  { %832 = vmatmul.bf16.vlgmr.msra.gmra.mxu3 %v322_v51  ;;  %v1402_v51 = vld [vmem:[#allocation2 + $0x1e0] sm:$0xff] }
  0x2b   :  { %876 = vmatpush.bf16.msrb.mxu3 %v1381_v42  ;;  %845 = vmatmul.bf16.vlgmr.msra.gmra.mxu0 %v323_v14  ;;  %v965_v14 = vld [vmem:[%s1686_s9 + $0x28] sm:$0xff] }
  0x2c   :  { %889 = vmatpush.bf16.msrb.mxu0 %v1389_v45  ;;  %858 = vmatmul.bf16.vlgmr.msrb.gmra.mxu1 %v324_v17 }
  0x2d   :  { %902 = vmatpush.bf16.msra.mxu1 %v1397_v54  ;;  %v1399_v54 = vld [vmem:[#allocation2 + $0x1c8] sm:$0xff] }
  0x2e   :  { %v332_v40 = vld [vmem:[#allocation1] sm:$0xff] }
  0x2f   :  { %877 = vmatpush.bf16.msrb.mxu3 %v1380_v49  ;;  %v1403_v49 = vld [vmem:[#allocation2 + $0x1e8] sm:$0xff] }
  0x30   :  { %890 = vmatpush.bf16.msrb.mxu0 %v1388_v50 }
  0x31   :  { %903 = vmatpush.bf16.msra.mxu1 %v1396_v58 }
  0x33   :  { %878 = vmatpush.bf16.msrb.mxu3 %v1379_v55  ;;  %v1398_v55 = vld [vmem:[#allocation2 + $0x1c0] sm:$0xff] }
  0x34   :  { %891 = vmatpush.bf16.msrb.mxu0 %v1387_v56 }
  0x35   :  { %904 = vmatpush.bf16.msra.mxu1 %v1395_v9 }
  0x37   :  { %879 = vmatpush.bf16.msrb.mxu3 %v1378_v59 }
  0x38   :  { %892 = vmatpush.bf16.msrb.mxu0 %v1386_v60 }
  0x39   :  { %905 = vmatpush.bf16.msra.mxu1 %v1394_v13 }
  0x3b   :  { %880 = vmatpush.bf16.msrb.mxu3 %v1377_v62 }
  0x3c   :  { %893 = vmatpush.bf16.msrb.mxu0 %v1385_v63  ;;  %v974_v63 = vld [vmem:[%s1686_s9 + $0x70] sm:$0xff] }
  0x3d   :  { %906 = vmatpush.bf16.msra.mxu1 %v1393_v18  ;;  %v963_v18 = vld [vmem:[%s1686_s9 + $0x18] sm:$0xff] }
  0x3f   :  { %881 = vmatpush.bf16.msrb.mxu3 %v1376_v1  ;;  %v973_v1 = vld [vmem:[%s1686_s9 + $0x68] sm:$0xff] }
  0x40   :  { %894 = vmatpush.bf16.msrb.mxu0 %v1384_v2  ;;  %v972_v2 = vld [vmem:[%s1686_s9 + $0x60] sm:$0xff] }
  0x41   :  { %907 = vmatpush.bf16.msra.mxu1 %v1392_v21  ;;  %v961_v21 = vld [vmem:[%s1686_s9 + $0x8] sm:$0xff] }
  0x43   :  { %882 = vmatpush.bf16.msrb.mxu3 %v1375_v4 }
  0x44   :  { %895 = vmatpush.bf16.msrb.mxu0 %v1383_v8  ;;  %v968_v8 = vld [vmem:[%s1686_s9 + $0x40] sm:$0xff] }
  0x45   :  { %908 = vmatpush.bf16.msra.mxu1 %v1391_v25 }
  0x47   :  { %883 = vmatpush.bf16.msrb.mxu3 %v1374_v5  ;;  %v970_v5 = vld [vmem:[%s1686_s9 + $0x50] sm:$0xff] }
  0x48   :  { %896 = vmatpush.bf16.msrb.mxu0 %v1382_v12  ;;  %v966_v12 = vld [vmem:[%s1686_s9 + $0x30] sm:$0xff] }
  0x49   :  { %909 = vmatpush.bf16.msra.mxu1 %v1390_v29 }
  0x4a   :  { %884 = vmatmul.bf16.vlgmr.msrb.gmra.mxu3 %v326_v22 }
  0x4b   :  { %928 = vmatpush.bf16.msra.mxu3 %v1413_v6  ;;  %897 = vmatmul.bf16.vlgmr.msrb.gmra.mxu0 %v327_v30 }
  0x4c   :  { %941 = vmatpush.bf16.msra.mxu0 %v1421_v16  ;;  %910 = vmatmul.bf16.vlgmr.msra.gmra.mxu1 %v328_v34  ;;  %v964_v16 = vld [vmem:[%s1686_s9 + $0x20] sm:$0xff] }
  0x4f   :  { %929 = vmatpush.bf16.msra.mxu3 %v1412_v10  ;;  %v967_v10 = vld [vmem:[%s1686_s9 + $0x38] sm:$0xff] }
  0x50   :  { %942 = vmatpush.bf16.msra.mxu0 %v1420_v20  ;;  %v962_v20 = vld [vmem:[%s1686_s9 + $0x10] sm:$0xff] }
  0x53   :  { %930 = vmatpush.bf16.msra.mxu3 %v1411_v15 }
  0x54   :  { %943 = vmatpush.bf16.msra.mxu0 %v1419_v24  ;;  %v960_v24 = vld [vmem:[%s1686_s9] sm:$0xff] }
  0x57   :  { %931 = vmatpush.bf16.msra.mxu3 %v1410_v19 }
  0x58   :  { %944 = vmatpush.bf16.msra.mxu0 %v1418_v27 }
  0x5b   :  { %932 = vmatpush.bf16.msra.mxu3 %v1409_v23 }
  0x5c   :  { %945 = vmatpush.bf16.msra.mxu0 %v1417_v32 }
  0x5f   :  { %933 = vmatpush.bf16.msra.mxu3 %v1408_v26 }
  0x63   :  { %934 = vmatpush.bf16.msra.mxu3 %v1407_v31 }
  0x67   :  { %935 = vmatpush.bf16.msra.mxu3 %v1406_v36 }
  0x6a   :  { %936 = vmatmul.bf16.vlgmr.msra.gmra.mxu3 %v332_v40  ;;  %v1429_v40 = vld [vmem:[%s1687_s10] ss:$0 sm:$0xff] }
  0x85   :  { %v86_v41 = vpop.f32.mrf.mxu1 }
  0x86   :  { %v87_v44 = vadd.f32 %v1426_v37, %v86_v41  ;;  %v1416_v37 = vld [vmem:[#allocation2 + $0x250] sm:$0xff] }
  0x87   :  { %946 = vmatpush.bf16.msra.mxu0 %v1416_v37 }
  0x88   :  { %v89_v48 = vmax.f32 %v87_v44, 0.0  ;;  %v1414_v44 = vld [vmem:[#allocation2 + $0x240] sm:$0xff] }
  0x8a   :  { %1020 = vmatmul.msk.f32.vlgmr.msra.gmra.mxu2 %vm102_vm2, %v89_v48  ;;  %v1404_v48 = vld [vmem:[#allocation2 + $0x1f0] sm:$0xff] }
  0x8b   :  { %863 = vmatpush.bf16.msra.mxu2 %v1373_v46  ;;  %947 = vmatpush.bf16.msra.mxu0 %v1415_v39  ;;  %v333_v46 = vld [vmem:[#allocation1 + $0x9] sm:$0xff] }
  0x8f   :  { %864 = vmatpush.bf16.msra.mxu2 %v1372_v52  ;;  %948 = vmatpush.bf16.msra.mxu0 %v1414_v44  ;;  %v1401_v52 = vld [vmem:[#allocation2 + $0x1d8] sm:$0xff] }
  0x92   :  { %949 = vmatmul.bf16.vlgmr.msra.gmra.mxu0 %v333_v46 }
  0x93   :  { %865 = vmatpush.bf16.msra.mxu2 %v1371_v57 }
  0x97   :  { %866 = vmatpush.bf16.msra.mxu2 %v1370_v61  ;;  %v975_v61 = vld [vmem:[%s1686_s9 + $0x78] sm:$0xff] }
  0x98   :  { %980 = vmatpush.msrb.mxu1 %v975_v61 }
  0x9a   :  { %981 = vmatpush.msrb.mxu1 %v974_v63 }
  0x9b   :  { %867 = vmatpush.bf16.msra.mxu2 %v1369_v0 }
  0x9c   :  { %982 = vmatpush.msrb.mxu1 %v973_v1 }
  0x9e   :  { %983 = vmatpush.msrb.mxu1 %v972_v2 }
  0x9f   :  { %868 = vmatpush.bf16.msra.mxu2 %v1368_v3  ;;  %v971_v3 = vld [vmem:[%s1686_s9 + $0x58] sm:$0xff] }
  0xa0   :  { %984 = vmatpush.msrb.mxu1 %v971_v3 }
  0xa2   :  { %985 = vmatpush.msrb.mxu1 %v970_v5 }
  0xa3   :  { %869 = vmatpush.bf16.msra.mxu2 %v1367_v7  ;;  %v969_v7 = vld [vmem:[%s1686_s9 + $0x48] sm:$0xff] }
  0xa4   :  { %986 = vmatpush.msrb.mxu1 %v969_v7 }
  0xa6   :  { %987 = vmatpush.msrb.mxu1 %v968_v8 }
  0xa7   :  { %870 = vmatpush.bf16.msra.mxu2 %v1366_v11 }
  0xa8   :  { %v846_v56 = vpop.f32.mrf.mxu0  ;;  %988 = vmatpush.msrb.mxu1 %v967_v10 }
  0xa9   :  { %v859_v57 = vpop.f32.mrf.mxu1 }
  0xaa   :  { %989 = vmatpush.msrb.mxu1 %v966_v12 }
  0xac   :  { %990 = vmatpush.msrb.mxu1 %v965_v14 }
  0xad   :  { %v1617_v47 = vpop.f32.mrf.mxu3 }
  0xae   :  { %991 = vmatpush.msrb.mxu1 %v964_v16 }
  0xb0   :  { %v848_v58 = vpop.f32.mrf.mxu0  ;;  %992 = vmatpush.msrb.mxu1 %v963_v18 }
  0xb1   :  { %v861_v59 = vpop.f32.mrf.mxu1 }
  0xb2   :  { %993 = vmatpush.msrb.mxu1 %v962_v20 }
  0xb4   :  { %994 = vmatpush.msrb.mxu1 %v961_v21 }
  0xb5   :  { %v835_v50 = vpop.f32.mrf.mxu3 }
  0xb6   :  { %995 = vmatpush.msrb.mxu1 %v960_v24 }
  0xc8   :  { %v898_v62 = vpop.f32.mrf.mxu0 }
  0xc9   :  { %v911_v0 = vpop.f32.mrf.mxu1 }
  0xcd   :  { %v885_v60 = vpop.f32.mrf.mxu3 }
  0xd0   :  { %v900_v6 = vpop.f32.mrf.mxu0 }
  0xd1   :  { %v913_v9 = vpop.f32.mrf.mxu1 }
  0xd5   :  { %v887_v4 = vpop.f32.mrf.mxu3 }
  0xed   :  { %v937_v11 = vpop.f32.mrf.mxu3 }
  0xf5   :  { %v939_v17 = vpop.f32.mrf.mxu3 }
 0x10d   :  { %v123_v41 = vpop.f32.mrf.mxu2 }
 0x10e   :  { %v124_v42 = vadd.f32 %v1427_v38, %v123_v41 }
 0x10f   :  { %v950_v13 = vpop.f32.mrf.mxu0 }
 0x110   :  { %v126_v45 = vmax.f32 %v124_v42, 0.0 }
 0x112   :  { %1021 = vmatmul.msk.f32.vlgmr.msrb.gmra.mxu2 %vm102_vm2, %v126_v45 }
 0x113   :  { %915 = vmatpush.bf16.msrb.mxu2 %v1405_v43 }
 0x117   :  { %916 = vmatpush.bf16.msrb.mxu2 %v1404_v48  ;;  %v952_v19 = vpop.f32.mrf.mxu0 }
 0x11a   :  { %871 = vmatmul.bf16.vlgmr.msra.gmra.mxu2 %v325_v28 }
 0x11b   :  { %917 = vmatpush.bf16.msrb.mxu2 %v1403_v49 }
 0x11f   :  { %918 = vmatpush.bf16.msrb.mxu2 %v1402_v51 }
 0x123   :  { %919 = vmatpush.bf16.msrb.mxu2 %v1401_v52 }
 0x127   :  { %920 = vmatpush.bf16.msrb.mxu2 %v1400_v53 }
 0x12b   :  { %921 = vmatpush.bf16.msrb.mxu2 %v1399_v54 }
 0x12f   :  { %922 = vmatpush.bf16.msrb.mxu2 %v1398_v55 }
 0x132   :  { %923 = vmatmul.bf16.vlgmr.msrb.gmra.mxu2 %v329_v35  ;;  %v1428_v35 = vld [vmem:[%s1685_s8] ss:$0 sm:$0xff] }
 0x195   :  { %v317_v15 = vpop.f32.mrf.mxu2 }
 0x196   :  { %v834_v23 = vadd.f32 %v1617_v47, %v317_v15 }
 0x198   :  { %v847_v25 = vadd.f32 %v846_v56, %v834_v23 }
 0x19a   :  { %v860_v27 = vadd.f32 %v859_v57, %v847_v25 }
 0x19d   :  { %v872_v22 = vpop.f32.mrf.mxu2 }
 0x19e   :  { %v873_v28 = vadd.f32 %v872_v22, %v860_v27 }
 0x1a0   :  { %v886_v29 = vadd.f32 %v885_v60, %v873_v28 }
 0x1a2   :  { %v899_v30 = vadd.f32 %v898_v62, %v886_v29 }
 0x1a4   :  { %v912_v31 = vadd.f32 %v911_v0, %v899_v30 }
 0x1a5   :  { %v874_v26 = vpop.f32.mrf.mxu2 }
 0x1b5   :  { %v924_v32 = vpop.f32.mrf.mxu2 }
 0x1b6   :  { %v925_v33 = vadd.f32 %v924_v32, %v912_v31 }
 0x1b8   :  { %v938_v34 = vadd.f32 %v937_v11, %v925_v33 }
 0x1ba   :  { %v951_v36 = vadd.f32 %v950_v13, %v938_v34 }
 0x1bc   :  { %v958_v37 = vadd.f32 %v1428_v35, %v951_v36 }
 0x1bd   :  { %v926_v38 = vpop.f32.mrf.mxu2 }
 0x1be   :  { %v959_v39 = vmax.f32 %v958_v37, 0.0 }
 0x1c0   :  { %996 = vmatmul.f32.vlgmr.msrb.gmra.mxu1 %v959_v39 }
 0x23d   :  { %v997_v41 = vpop.f32.mrf.mxu1 }
 0x23e   :  { %v998_v42 = vadd.f32 %v1429_v40, %v997_v41 }
 0x240   :  { %1000 = vst [vmem:[#allocation5] sm:$0x3] %v998_v42 }
 0x241   :  { %1011 = dma.vmem_to_hbm [thread:$0]  %s1007_s4, 32, %s1009_s29, [#allocation4]  }
 0x242   :  { %1480 = dma.done.wait [#allocation4], 32  }
 0x243   :  { %1481 = vsyncadd [#allocation4], 4294967264 }
 0x244   :  { %1016 = vsyncpa [#allocation3], 1 }
 0x245   :  { %1017 = vsyncpa [#allocation4], 1 }

</bundles_post_ra>
